<compile_context>
chip_gen: v7x
topology: tpu7x:2x2x1
jax: 0.10.0
libtpu: 0.0.40
codegen_flags: <defaults>
</compile_context>

<pallas_src>
import functools

import jax
import jax.numpy as jnp
import numpy as np
from jax import lax
from jax.experimental import pallas as pl
from jax.experimental.pallas import tpu as pltpu

EPS = 1e-5  # BatchNorm eps


# --------------------------- fused Pallas kernel ------------------------------

def _dense_layer_kernel(x_ref, w1_ref, b1_ref, mg_ref, wtap_ref, o_ref, *, shifts):
    """Fused conv_1 (dynamic 1x1x1 + BN + ReLU) and conv_2 (grouped 3x3x3,
    padding=1, no bias), plus the channel concat with the input, for a block
    of BB batches.

    x_ref:    (BB, Cin, S)          flattened input
    w1_ref:   (BB, Cout1, Cin)      per-batch aggregated 1x1x1 weight, BN folded
    b1_ref:   (BB, Cout1, 1)        per-batch aggregated bias, BN folded
    mg_ref:   (27, growth, S)       zero-padding validity mask per tap (pre-broadcast)
    wtap_ref: (27, growth, Cout1)   per-tap dense (block-diagonal grouped) weight
    o_ref:    (BB, Cin+growth, S)   concat([x, conv_2(relu(bn(conv_1(x))))])
    """
    BB, Cin, S = x_ref.shape
    growth = wtap_ref.shape[1]

    # conv_1 fused with BN + ReLU:  y = relu((scale*W_b) @ x + scale*b_b + shift)
    xs, ys = [], []
    for bb in range(BB):                                        # static unroll
        xv = x_ref[bb]                                          # (Cin, S)
        xs.append(xv)
        y = jnp.dot(w1_ref[bb], xv, preferred_element_type=jnp.float32)
        ys.append(jnp.maximum(y + b1_ref[bb], 0.0))             # (Cout1, S)

    # conv_2: accumulate the 27 taps in-register (no im2col scratch). The tap
    # shift is an XLU lane rotation; the zero-pad mask is applied to the
    # (growth, S) matmul result as a plain VPU multiply with a pre-broadcast
    # mask loaded straight from VMEM (no in-kernel sublane broadcast).
    accs = [jnp.zeros((growth, S), jnp.float32) for _ in range(BB)]
    for t, sh in enumerate(shifts):                             # static unroll
        w_t = wtap_ref[t]                                       # (growth, Cout1)
        m_t = mg_ref[t]                                         # (growth, S)
        for bb in range(BB):
            shifted = ys[bb] if sh == 0 else pltpu.roll(ys[bb], shift=sh, axis=1)
            accs[bb] = accs[bb] + jnp.dot(
                w_t, shifted, preferred_element_type=jnp.float32) * m_t

    # emit concat([x, out]) directly into the lane-dense output block
    for bb in range(BB):
        o_ref[bb, :Cin, :] = xs[bb]
        o_ref[bb, Cin:, :] = accs[bb]


# --------------------------- wrapper-side helpers -----------------------------

def _tap_masks_shifts(D, H, W):
    """Per-tap lane shift (as a non-negative circular roll) and validity mask
    implementing padding=1 for a 3x3x3 conv on the flattened S = D*H*W axis."""
    S = D * H * W
    idx = np.arange(S)
    d = idx // (H * W)
    h = (idx // W) % H
    w = idx % W
    masks, shifts = [], []
    for kd in range(3):
        for kh in range(3):
            for kw in range(3):
                od, oh, ow = kd - 1, kh - 1, kw - 1
                delta = od * H * W + oh * W + ow       # source = dest + delta
                valid = ((d + od >= 0) & (d + od < D) &
                         (h + oh >= 0) & (h + oh < H) &
                         (w + ow >= 0) & (w + ow < W))
                masks.append(valid.astype(np.float32))
                shifts.append(int((-delta) % S))       # roll so out[s] = y[s+delta]
    return np.stack(masks, axis=0), tuple(shifts)      # (27, S), 27 ints


def _grouped_tap_weight(c2_w, G):
    """(growth, Cin_g, 3,3,3) grouped weight -> per-tap dense block-diagonal
    matrices (27, growth, Cout1), tap order t = kd*9 + kh*3 + kw."""
    growth, Cin_g = c2_w.shape[0], c2_w.shape[1]
    Cout_g = growth // G
    Cout1 = G * Cin_g
    w = c2_w.reshape(growth, Cin_g, 27)
    wt = jnp.zeros((27, growth, Cout1), c2_w.dtype)
    for g in range(G):
        blk = jnp.transpose(w[g * Cout_g:(g + 1) * Cout_g], (2, 0, 1))  # (27,Cout_g,Cin_g)
        wt = wt.at[:, g * Cout_g:(g + 1) * Cout_g,
                   g * Cin_g:(g + 1) * Cin_g].set(blk)
    return wt                                            # (27, growth, Cout1)


def _default_batch_per_step(B):
    """Fold the whole batch into one grid step on single-TensorCore chips
    (v5e/v6e); keep one batch per step (parallel grid) on multi-TC chips
    (v7x, and the megacore v2-v4 generations)."""
    try:
        kind = jax.devices()[0].device_kind.lower()
    except Exception:
        return 1
    single_tc = any(t in kind for t in ("v5 lite", "v5e", "v5litepod",
                                        "v6 lite", "v6e", "v6lite"))
    return B if single_tc else 1


# ------------------------------ JAX glue --------------------------------------

def bn_eval(x, gamma, beta, mean, var):
    # inference-mode BatchNorm over the trailing channel axis
    return (x - mean) / jnp.sqrt(var + EPS) * gamma + beta


def propagate_attention(pooled, p):
    # CKGConv3d.keys applied to the (B, C, 1, 1, 1) pooled tensor == (B, C).
    a = bn_eval(pooled, p['bn1_g'], p['bn1_b'], p['bn1_m'], p['bn1_v'])
    a = jax.nn.gelu(a, approximate=False)
    a = a @ p['k1_w'].T + p['k1_b']
    a = bn_eval(a, p['bn2_g'], p['bn2_b'], p['bn2_m'], p['bn2_v'])
    a = jax.nn.gelu(a, approximate=False)
    a = a @ p['k2_w'].T + p['k2_b']
    a = a + pooled                                 # ResidualLayer: x + x_res
    a = bn_eval(a, p['bn3_g'], p['bn3_b'], p['bn3_m'], p['bn3_v'])
    a = a @ p['k3_w'].T + p['k3_b']                # (B, K)
    return jax.nn.softmax(a / p['temperature'], axis=1)


def dense_layer_forward(x, p, G, batch_per_step=None):
    B, Cin, D, H, W = x.shape
    S = D * H * W
    K, Cout1, _ = p['ck_w'].shape
    growth = p['c2_w'].shape[0]

    x2d = x.reshape(B, Cin, S)

    # --- CKGConv3d attention: global pool + tiny MLP (plain JAX / XLA) ---
    pooled = jnp.mean(x2d, axis=-1)                                 # (B, Cin)
    attn = propagate_attention(pooled, p)                           # (B, K)
    agg_w = (attn @ p['ck_w'].reshape(K, -1)).reshape(B, Cout1, Cin)
    agg_b = attn @ p['ck_b']                                        # (B, Cout1)

    # Fold conv_2's inference BatchNorm into the dynamic weight/bias.
    scale = p['c2bn_g'] / jnp.sqrt(p['c2bn_v'] + EPS)
    shift = p['c2bn_b'] - p['c2bn_m'] * scale
    w1 = agg_w * scale[None, :, None]                               # (B, Cout1, Cin)
    b1 = (agg_b * scale[None, :] + shift[None, :])[:, :, None]      # (B, Cout1, 1)

    masks_np, shifts = _tap_masks_shifts(D, H, W)
    # Pre-broadcast the per-tap validity masks to the conv_2 output rows: the
    # per-lane 0/1 mask commutes with the matmul, so the kernel multiplies the
    # (growth, S) tap result by a plain-loaded mask (pure vld, no XLU broadcast).
    masks_g = jnp.asarray(np.repeat(masks_np[:, None, :], growth, axis=1))
    w_tap = _grouped_tap_weight(p['c2_w'], G)                       # (27, growth, Cout1)

    if batch_per_step is None:
        batch_per_step = _default_batch_per_step(B)
    BB = batch_per_step if (batch_per_step > 0 and B % batch_per_step == 0) else 1

    kernel = functools.partial(_dense_layer_kernel, shifts=shifts)
    # TODO(synk): for large D*H*W, add an S grid axis tiled along D (tiles that
    # are multiples of H*W and of 128 lanes) with a +/-H*W halo so the roll-based
    # taps stay correct across tile edges, generate the validity masks in-kernel
    # via broadcasted_iota, and size tiles against v7x's 64 MiB per-core VMEM.
    # TODO(synk): once S is tiled up, mark masks_g / w_tap single-buffered
    # (pipeline_mode=pl.Buffered(1)); negligible VMEM at the current shapes.
    out2d = pl.pallas_call(
        kernel,
        out_shape=jax.ShapeDtypeStruct((B, Cin + growth, S), jnp.float32),
        grid=(B // BB,),
        in_specs=[
            pl.BlockSpec((BB, Cin, S), lambda b: (b, 0, 0)),
            pl.BlockSpec((BB, Cout1, Cin), lambda b: (b, 0, 0)),
            pl.BlockSpec((BB, Cout1, 1), lambda b: (b, 0, 0)),
            pl.BlockSpec((27, growth, S), lambda b: (0, 0, 0)),        # constant
            pl.BlockSpec((27, growth, Cout1), lambda b: (0, 0, 0)),    # constant
        ],
        out_specs=pl.BlockSpec((BB, Cin + growth, S), lambda b: (b, 0, 0)),
        compiler_params=pltpu.CompilerParams(dimension_semantics=("parallel",)),
    )(x2d, w1, b1, masks_g, w_tap)

    return out2d.reshape(B, Cin + growth, D, H, W)


# --------------------------- params & reference -------------------------------

def init_params(key, Cin, Cout1, growth, G, K=4):
    ks = jax.random.split(key, 6)

    def tn(k, shape, std=0.02):
        return (std * jax.random.truncated_normal(k, -2.0, 2.0, shape)).astype(jnp.float32)

    p = {}
    # TODO(synk): BatchNorm implemented in inference mode (running stats); train-mode batch statistics not modeled.
    for i in (1, 2, 3):
        p[f'bn{i}_g'] = jnp.ones((Cin,), jnp.float32)
        p[f'bn{i}_b'] = jnp.zeros((Cin,), jnp.float32)
        p[f'bn{i}_m'] = jnp.zeros((Cin,), jnp.float32)
        p[f'bn{i}_v'] = jnp.ones((Cin,), jnp.float32)
    p['k1_w'] = tn(ks[0], (Cin, Cin))
    p['k1_b'] = jnp.linspace(-0.01, 0.01, Cin, dtype=jnp.float32)
    p['k2_w'] = tn(ks[1], (Cin, Cin))
    p['k2_b'] = jnp.linspace(0.01, -0.01, Cin, dtype=jnp.float32)
    p['k3_w'] = tn(ks[2], (K, Cin))
    p['k3_b'] = jnp.linspace(-0.02, 0.02, K, dtype=jnp.float32)
    p['temperature'] = jnp.float32(34.0)
    # dynamic kernel bank (kernel_size=1 dims squeezed) + its per-expert bias
    p['ck_w'] = 0.1 * jax.random.normal(ks[3], (K, Cout1, Cin), jnp.float32)
    p['ck_b'] = 0.05 * jax.random.normal(ks[4], (K, Cout1), jnp.float32)
    # conv_2: BatchNorm3d(Cout1) inference params + grouped 3x3x3 weight
    c = jnp.arange(Cout1, dtype=jnp.float32)
    p['c2bn_g'] = 1.0 + 0.1 * jnp.cos(c)
    p['c2bn_b'] = 0.05 * jnp.sin(c)
    p['c2bn_m'] = 0.1 * jnp.sin(c + 0.5)
    p['c2bn_v'] = 1.0 + 0.2 * jnp.abs(jnp.cos(c))
    p['c2_w'] = 0.05 * jax.random.normal(ks[5], (growth, Cout1 // G, 3, 3, 3),
                                         jnp.float32)
    return p


def ref_forward(x, p, G):
    """Pure-JAX reference of the PyTorch forward (inference-mode BN)."""
    B, Cin, D, H, W = x.shape
    K, Cout1, _ = p['ck_w'].shape
    pooled = jnp.mean(x, axis=(2, 3, 4))
    attn = propagate_attention(pooled, p)
    agg_w = (attn @ p['ck_w'].reshape(K, -1)).reshape(B, Cout1, Cin)
    agg_b = attn @ p['ck_b']
    y = jnp.einsum('boc,bcdhw->bodhw', agg_w, x) + agg_b[:, :, None, None, None]
    scale = p['c2bn_g'] / jnp.sqrt(p['c2bn_v'] + EPS)
    shift = p['c2bn_b'] - p['c2bn_m'] * scale
    y = jnp.maximum(y * scale[None, :, None, None, None]
                    + shift[None, :, None, None, None], 0.0)
    out = lax.conv_general_dilated(
        y, p['c2_w'], window_strides=(1, 1, 1),
        padding=((1, 1), (1, 1), (1, 1)),
        dimension_numbers=('NCDHW', 'OIDHW', 'NCDHW'),
        feature_group_count=G)
    return jnp.concatenate([x, out], axis=1)


# ----------------------------------- main --------------------------------------

if __name__ == "__main__":
    # _DenseLayer(in_channels=8, growth_rate=8, bottleneck=2, ..., group_3x3=2)
    B, Cin, D, H, W = 2, 8, 4, 8, 8
    growth, bottleneck, G = 8, 2, 2
    Cout1 = bottleneck * growth  # 16

    key = jax.random.PRNGKey(0)
    kx, kp = jax.random.split(key)
    x = jax.random.normal(kx, (B, Cin, D, H, W), jnp.float32)
    params = init_params(kp, Cin, Cout1, growth, G)

    fwd = jax.jit(functools.partial(dense_layer_forward, G=G))
    out = fwd(x, params)
    out = jax.block_until_ready(out)

    ref = ref_forward(x, params, G)
    assert out.shape == (B, Cin + growth, D, H, W)
    np.testing.assert_allclose(np.asarray(out), np.asarray(ref),
                               rtol=1e-3, atol=1e-3)
    print("KERNEL_OK")
</pallas_src>

<mosaic_0001>
module attributes {stable_mosaic.version = 11 : i64} {
  func.func @_dense_layer_kernel(%arg0: i32, %arg1: memref<1x8x256xf32, #tpu.memory_space<vmem>>, %arg2: memref<1x16x8xf32, #tpu.memory_space<vmem>>, %arg3: memref<1x16x1xf32, #tpu.memory_space<vmem>>, %arg4: memref<27x8x256xf32, #tpu.memory_space<vmem>>, %arg5: memref<27x8x16xf32, #tpu.memory_space<vmem>>, %arg6: memref<1x16x256xf32, #tpu.memory_space<vmem>>) attributes {dimension_semantics = [#tpu.dimension_semantics<parallel>], iteration_bounds = array<i64: 2>, scalar_prefetch = 0 : i64, scratch_operands = 0 : i64, tpu.core_type = #tpu.core_type<tc>, window_params = [{transform_indices = @transform_0, window_bounds = array<i64: 1, 8, 256>}, {transform_indices = @transform_1, window_bounds = array<i64: 1, 16, 8>}, {transform_indices = @transform_2, window_bounds = array<i64: 1, 16, 1>}, {pipeline_mode = #tpu.pipeline_mode<synchronous>, transform_indices = @transform_3, window_bounds = array<i64: 27, 8, 256>}, {pipeline_mode = #tpu.pipeline_mode<synchronous>, transform_indices = @transform_4, window_bounds = array<i64: 27, 8, 16>}, {transform_indices = @transform_5, window_bounds = array<i64: 1, 16, 256>}]} {
    %c0 = arith.constant 0 : index
    %c0_0 = arith.constant 0 : index
    %c0_1 = arith.constant 0 : index
    %0 = vector.load %arg1[%c0, %c0_0, %c0_1] : memref<1x8x256xf32, #tpu.memory_space<vmem>>, vector<1x8x256xf32>
    %1 = vector.shape_cast %0 : vector<1x8x256xf32> to vector<8x256xf32>
    %c0_2 = arith.constant 0 : index
    %c0_3 = arith.constant 0 : index
    %c0_4 = arith.constant 0 : index
    %2 = vector.load %arg2[%c0_2, %c0_3, %c0_4] : memref<1x16x8xf32, #tpu.memory_space<vmem>>, vector<1x16x8xf32>
    %3 = vector.shape_cast %2 : vector<1x16x8xf32> to vector<16x8xf32>
    %cst = arith.constant dense<0.000000e+00> : vector<16x256xf32>
    %4 = tpu.matmul %3, %1, %cst {dimension_numbers = #tpu.dot_dimension_numbers<[1], [0], [0], [1], [0, 0, 1, 1], [], []>} : vector<16x8xf32>, vector<8x256xf32>, vector<16x256xf32> -> vector<16x256xf32>
    %c0_5 = arith.constant 0 : index
    %c0_6 = arith.constant 0 : index
    %c0_7 = arith.constant 0 : index
    %5 = vector.load %arg3[%c0_5, %c0_6, %c0_7] : memref<1x16x1xf32, #tpu.memory_space<vmem>>, vector<1x16x1xf32>
    %6 = vector.shape_cast %5 : vector<1x16x1xf32> to vector<16x1xf32>
    %7 = vector.broadcast %6 : vector<16x1xf32> to vector<16x256xf32>
    %8 = arith.addf %4, %7 : vector<16x256xf32>
    %cst_8 = arith.constant 0.000000e+00 : f32
    %9 = vector.broadcast %cst_8 : f32 to vector<16x256xf32>
    %10 = arith.maximumf %8, %9 : vector<16x256xf32>
    %cst_9 = arith.constant 0.000000e+00 : f32
    %11 = vector.broadcast %cst_9 : f32 to vector<8x256xf32>
    %c0_10 = arith.constant 0 : index
    %c0_11 = arith.constant 0 : index
    %c0_12 = arith.constant 0 : index
    %12 = vector.load %arg5[%c0_10, %c0_11, %c0_12] : memref<27x8x16xf32, #tpu.memory_space<vmem>>, vector<1x8x16xf32>
    %13 = vector.shape_cast %12 : vector<1x8x16xf32> to vector<8x16xf32>
    %c0_13 = arith.constant 0 : index
    %c0_14 = arith.constant 0 : index
    %c0_15 = arith.constant 0 : index
    %14 = vector.load %arg4[%c0_13, %c0_14, %c0_15] : memref<27x8x256xf32, #tpu.memory_space<vmem>>, vector<1x8x256xf32>
    %15 = vector.shape_cast %14 : vector<1x8x256xf32> to vector<8x256xf32>
    %c73_i32 = arith.constant 73 : i32
    %16 = tpu.dynamic_rotate %10 by %c73_i32 dim 1 : vector<16x256xf32>, i32 -> vector<16x256xf32>
    %cst_16 = arith.constant dense<0.000000e+00> : vector<8x256xf32>
    %17 = tpu.matmul %13, %16, %cst_16 {dimension_numbers = #tpu.dot_dimension_numbers<[1], [0], [0], [1], [0, 0, 1, 1], [], []>} : vector<8x16xf32>, vector<16x256xf32>, vector<8x256xf32> -> vector<8x256xf32>
    %18 = arith.mulf %17, %15 : vector<8x256xf32>
    %19 = arith.addf %11, %18 : vector<8x256xf32>
    %c1 = arith.constant 1 : index
    %c0_17 = arith.constant 0 : index
    %c0_18 = arith.constant 0 : index
    %20 = vector.load %arg5[%c1, %c0_17, %c0_18] : memref<27x8x16xf32, #tpu.memory_space<vmem>>, vector<1x8x16xf32>
    %21 = vector.shape_cast %20 : vector<1x8x16xf32> to vector<8x16xf32>
    %c1_19 = arith.constant 1 : index
    %c0_20 = arith.constant 0 : index
    %c0_21 = arith.constant 0 : index
    %22 = vector.load %arg4[%c1_19, %c0_20, %c0_21] : memref<27x8x256xf32, #tpu.memory_space<vmem>>, vector<1x8x256xf32>
    %23 = vector.shape_cast %22 : vector<1x8x256xf32> to vector<8x256xf32>
    %c72_i32 = arith.constant 72 : i32
    %24 = tpu.dynamic_rotate %10 by %c72_i32 dim 1 : vector<16x256xf32>, i32 -> vector<16x256xf32>
    %cst_22 = arith.constant dense<0.000000e+00> : vector<8x256xf32>
    %25 = tpu.matmul %21, %24, %cst_22 {dimension_numbers = #tpu.dot_dimension_numbers<[1], [0], [0], [1], [0, 0, 1, 1], [], []>} : vector<8x16xf32>, vector<16x256xf32>, vector<8x256xf32> -> vector<8x256xf32>
    %26 = arith.mulf %25, %23 : vector<8x256xf32>
    %27 = arith.addf %19, %26 : vector<8x256xf32>
    %c2 = arith.constant 2 : index
    %c0_23 = arith.constant 0 : index
    %c0_24 = arith.constant 0 : index
    %28 = vector.load %arg5[%c2, %c0_23, %c0_24] : memref<27x8x16xf32, #tpu.memory_space<vmem>>, vector<1x8x16xf32>
    %29 = vector.shape_cast %28 : vector<1x8x16xf32> to vector<8x16xf32>
    %c2_25 = arith.constant 2 : index
    %c0_26 = arith.constant 0 : index
    %c0_27 = arith.constant 0 : index
    %30 = vector.load %arg4[%c2_25, %c0_26, %c0_27] : memref<27x8x256xf32, #tpu.memory_space<vmem>>, vector<1x8x256xf32>
    %31 = vector.shape_cast %30 : vector<1x8x256xf32> to vector<8x256xf32>
    %c71_i32 = arith.constant 71 : i32
    %32 = tpu.dynamic_rotate %10 by %c71_i32 dim 1 : vector<16x256xf32>, i32 -> vector<16x256xf32>
    %cst_28 = arith.constant dense<0.000000e+00> : vector<8x256xf32>
    %33 = tpu.matmul %29, %32, %cst_28 {dimension_numbers = #tpu.dot_dimension_numbers<[1], [0], [0], [1], [0, 0, 1, 1], [], []>} : vector<8x16xf32>, vector<16x256xf32>, vector<8x256xf32> -> vector<8x256xf32>
    %34 = arith.mulf %33, %31 : vector<8x256xf32>
    %35 = arith.addf %27, %34 : vector<8x256xf32>
    %c3 = arith.constant 3 : index
    %c0_29 = arith.constant 0 : index
    %c0_30 = arith.constant 0 : index
    %36 = vector.load %arg5[%c3, %c0_29, %c0_30] : memref<27x8x16xf32, #tpu.memory_space<vmem>>, vector<1x8x16xf32>
    %37 = vector.shape_cast %36 : vector<1x8x16xf32> to vector<8x16xf32>
    %c3_31 = arith.constant 3 : index
    %c0_32 = arith.constant 0 : index
    %c0_33 = arith.constant 0 : index
    %38 = vector.load %arg4[%c3_31, %c0_32, %c0_33] : memref<27x8x256xf32, #tpu.memory_space<vmem>>, vector<1x8x256xf32>
    %39 = vector.shape_cast %38 : vector<1x8x256xf32> to vector<8x256xf32>
    %c65_i32 = arith.constant 65 : i32
    %40 = tpu.dynamic_rotate %10 by %c65_i32 dim 1 : vector<16x256xf32>, i32 -> vector<16x256xf32>
    %cst_34 = arith.constant dense<0.000000e+00> : vector<8x256xf32>
    %41 = tpu.matmul %37, %40, %cst_34 {dimension_numbers = #tpu.dot_dimension_numbers<[1], [0], [0], [1], [0, 0, 1, 1], [], []>} : vector<8x16xf32>, vector<16x256xf32>, vector<8x256xf32> -> vector<8x256xf32>
    %42 = arith.mulf %41, %39 : vector<8x256xf32>
    %43 = arith.addf %35, %42 : vector<8x256xf32>
    %c4 = arith.constant 4 : index
    %c0_35 = arith.constant 0 : index
    %c0_36 = arith.constant 0 : index
    %44 = vector.load %arg5[%c4, %c0_35, %c0_36] : memref<27x8x16xf32, #tpu.memory_space<vmem>>, vector<1x8x16xf32>
    %45 = vector.shape_cast %44 : vector<1x8x16xf32> to vector<8x16xf32>
    %c4_37 = arith.constant 4 : index
    %c0_38 = arith.constant 0 : index
    %c0_39 = arith.constant 0 : index
    %46 = vector.load %arg4[%c4_37, %c0_38, %c0_39] : memref<27x8x256xf32, #tpu.memory_space<vmem>>, vector<1x8x256xf32>
    %47 = vector.shape_cast %46 : vector<1x8x256xf32> to vector<8x256xf32>
    %c64_i32 = arith.constant 64 : i32
    %48 = tpu.dynamic_rotate %10 by %c64_i32 dim 1 : vector<16x256xf32>, i32 -> vector<16x256xf32>
    %cst_40 = arith.constant dense<0.000000e+00> : vector<8x256xf32>
    %49 = tpu.matmul %45, %48, %cst_40 {dimension_numbers = #tpu.dot_dimension_numbers<[1], [0], [0], [1], [0, 0, 1, 1], [], []>} : vector<8x16xf32>, vector<16x256xf32>, vector<8x256xf32> -> vector<8x256xf32>
    %50 = arith.mulf %49, %47 : vector<8x256xf32>
    %51 = arith.addf %43, %50 : vector<8x256xf32>
    %c5 = arith.constant 5 : index
    %c0_41 = arith.constant 0 : index
    %c0_42 = arith.constant 0 : index
    %52 = vector.load %arg5[%c5, %c0_41, %c0_42] : memref<27x8x16xf32, #tpu.memory_space<vmem>>, vector<1x8x16xf32>
    %53 = vector.shape_cast %52 : vector<1x8x16xf32> to vector<8x16xf32>
    %c5_43 = arith.constant 5 : index
    %c0_44 = arith.constant 0 : index
    %c0_45 = arith.constant 0 : index
    %54 = vector.load %arg4[%c5_43, %c0_44, %c0_45] : memref<27x8x256xf32, #tpu.memory_space<vmem>>, vector<1x8x256xf32>
    %55 = vector.shape_cast %54 : vector<1x8x256xf32> to vector<8x256xf32>
    %c63_i32 = arith.constant 63 : i32
    %56 = tpu.dynamic_rotate %10 by %c63_i32 dim 1 : vector<16x256xf32>, i32 -> vector<16x256xf32>
    %cst_46 = arith.constant dense<0.000000e+00> : vector<8x256xf32>
    %57 = tpu.matmul %53, %56, %cst_46 {dimension_numbers = #tpu.dot_dimension_numbers<[1], [0], [0], [1], [0, 0, 1, 1], [], []>} : vector<8x16xf32>, vector<16x256xf32>, vector<8x256xf32> -> vector<8x256xf32>
    %58 = arith.mulf %57, %55 : vector<8x256xf32>
    %59 = arith.addf %51, %58 : vector<8x256xf32>
    %c6 = arith.constant 6 : index
    %c0_47 = arith.constant 0 : index
    %c0_48 = arith.constant 0 : index
    %60 = vector.load %arg5[%c6, %c0_47, %c0_48] : memref<27x8x16xf32, #tpu.memory_space<vmem>>, vector<1x8x16xf32>
    %61 = vector.shape_cast %60 : vector<1x8x16xf32> to vector<8x16xf32>
    %c6_49 = arith.constant 6 : index
    %c0_50 = arith.constant 0 : index
    %c0_51 = arith.constant 0 : index
    %62 = vector.load %arg4[%c6_49, %c0_50, %c0_51] : memref<27x8x256xf32, #tpu.memory_space<vmem>>, vector<1x8x256xf32>
    %63 = vector.shape_cast %62 : vector<1x8x256xf32> to vector<8x256xf32>
    %c57_i32 = arith.constant 57 : i32
    %64 = tpu.dynamic_rotate %10 by %c57_i32 dim 1 : vector<16x256xf32>, i32 -> vector<16x256xf32>
    %cst_52 = arith.constant dense<0.000000e+00> : vector<8x256xf32>
    %65 = tpu.matmul %61, %64, %cst_52 {dimension_numbers = #tpu.dot_dimension_numbers<[1], [0], [0], [1], [0, 0, 1, 1], [], []>} : vector<8x16xf32>, vector<16x256xf32>, vector<8x256xf32> -> vector<8x256xf32>
    %66 = arith.mulf %65, %63 : vector<8x256xf32>
    %67 = arith.addf %59, %66 : vector<8x256xf32>
    %c7 = arith.constant 7 : index
    %c0_53 = arith.constant 0 : index
    %c0_54 = arith.constant 0 : index
    %68 = vector.load %arg5[%c7, %c0_53, %c0_54] : memref<27x8x16xf32, #tpu.memory_space<vmem>>, vector<1x8x16xf32>
    %69 = vector.shape_cast %68 : vector<1x8x16xf32> to vector<8x16xf32>
    %c7_55 = arith.constant 7 : index
    %c0_56 = arith.constant 0 : index
    %c0_57 = arith.constant 0 : index
    %70 = vector.load %arg4[%c7_55, %c0_56, %c0_57] : memref<27x8x256xf32, #tpu.memory_space<vmem>>, vector<1x8x256xf32>
    %71 = vector.shape_cast %70 : vector<1x8x256xf32> to vector<8x256xf32>
    %c56_i32 = arith.constant 56 : i32
    %72 = tpu.dynamic_rotate %10 by %c56_i32 dim 1 : vector<16x256xf32>, i32 -> vector<16x256xf32>
    %cst_58 = arith.constant dense<0.000000e+00> : vector<8x256xf32>
    %73 = tpu.matmul %69, %72, %cst_58 {dimension_numbers = #tpu.dot_dimension_numbers<[1], [0], [0], [1], [0, 0, 1, 1], [], []>} : vector<8x16xf32>, vector<16x256xf32>, vector<8x256xf32> -> vector<8x256xf32>
    %74 = arith.mulf %73, %71 : vector<8x256xf32>
    %75 = arith.addf %67, %74 : vector<8x256xf32>
    %c8 = arith.constant 8 : index
    %c0_59 = arith.constant 0 : index
    %c0_60 = arith.constant 0 : index
    %76 = vector.load %arg5[%c8, %c0_59, %c0_60] : memref<27x8x16xf32, #tpu.memory_space<vmem>>, vector<1x8x16xf32>
    %77 = vector.shape_cast %76 : vector<1x8x16xf32> to vector<8x16xf32>
    %c8_61 = arith.constant 8 : index
    %c0_62 = arith.constant 0 : index
    %c0_63 = arith.constant 0 : index
    %78 = vector.load %arg4[%c8_61, %c0_62, %c0_63] : memref<27x8x256xf32, #tpu.memory_space<vmem>>, vector<1x8x256xf32>
    %79 = vector.shape_cast %78 : vector<1x8x256xf32> to vector<8x256xf32>
    %c55_i32 = arith.constant 55 : i32
    %80 = tpu.dynamic_rotate %10 by %c55_i32 dim 1 : vector<16x256xf32>, i32 -> vector<16x256xf32>
    %cst_64 = arith.constant dense<0.000000e+00> : vector<8x256xf32>
    %81 = tpu.matmul %77, %80, %cst_64 {dimension_numbers = #tpu.dot_dimension_numbers<[1], [0], [0], [1], [0, 0, 1, 1], [], []>} : vector<8x16xf32>, vector<16x256xf32>, vector<8x256xf32> -> vector<8x256xf32>
    %82 = arith.mulf %81, %79 : vector<8x256xf32>
    %83 = arith.addf %75, %82 : vector<8x256xf32>
    %c9 = arith.constant 9 : index
    %c0_65 = arith.constant 0 : index
    %c0_66 = arith.constant 0 : index
    %84 = vector.load %arg5[%c9, %c0_65, %c0_66] : memref<27x8x16xf32, #tpu.memory_space<vmem>>, vector<1x8x16xf32>
    %85 = vector.shape_cast %84 : vector<1x8x16xf32> to vector<8x16xf32>
    %c9_67 = arith.constant 9 : index
    %c0_68 = arith.constant 0 : index
    %c0_69 = arith.constant 0 : index
    %86 = vector.load %arg4[%c9_67, %c0_68, %c0_69] : memref<27x8x256xf32, #tpu.memory_space<vmem>>, vector<1x8x256xf32>
    %87 = vector.shape_cast %86 : vector<1x8x256xf32> to vector<8x256xf32>
    %c9_i32 = arith.constant 9 : i32
    %88 = tpu.dynamic_rotate %10 by %c9_i32 dim 1 : vector<16x256xf32>, i32 -> vector<16x256xf32>
    %cst_70 = arith.constant dense<0.000000e+00> : vector<8x256xf32>
    %89 = tpu.matmul %85, %88, %cst_70 {dimension_numbers = #tpu.dot_dimension_numbers<[1], [0], [0], [1], [0, 0, 1, 1], [], []>} : vector<8x16xf32>, vector<16x256xf32>, vector<8x256xf32> -> vector<8x256xf32>
    %90 = arith.mulf %89, %87 : vector<8x256xf32>
    %91 = arith.addf %83, %90 : vector<8x256xf32>
    %c10 = arith.constant 10 : index
    %c0_71 = arith.constant 0 : index
    %c0_72 = arith.constant 0 : index
    %92 = vector.load %arg5[%c10, %c0_71, %c0_72] : memref<27x8x16xf32, #tpu.memory_space<vmem>>, vector<1x8x16xf32>
    %93 = vector.shape_cast %92 : vector<1x8x16xf32> to vector<8x16xf32>
    %c10_73 = arith.constant 10 : index
    %c0_74 = arith.constant 0 : index
    %c0_75 = arith.constant 0 : index
    %94 = vector.load %arg4[%c10_73, %c0_74, %c0_75] : memref<27x8x256xf32, #tpu.memory_space<vmem>>, vector<1x8x256xf32>
    %95 = vector.shape_cast %94 : vector<1x8x256xf32> to vector<8x256xf32>
    %c8_i32 = arith.constant 8 : i32
    %96 = tpu.dynamic_rotate %10 by %c8_i32 dim 1 : vector<16x256xf32>, i32 -> vector<16x256xf32>
    %cst_76 = arith.constant dense<0.000000e+00> : vector<8x256xf32>
    %97 = tpu.matmul %93, %96, %cst_76 {dimension_numbers = #tpu.dot_dimension_numbers<[1], [0], [0], [1], [0, 0, 1, 1], [], []>} : vector<8x16xf32>, vector<16x256xf32>, vector<8x256xf32> -> vector<8x256xf32>
    %98 = arith.mulf %97, %95 : vector<8x256xf32>
    %99 = arith.addf %91, %98 : vector<8x256xf32>
    %c11 = arith.constant 11 : index
    %c0_77 = arith.constant 0 : index
    %c0_78 = arith.constant 0 : index
    %100 = vector.load %arg5[%c11, %c0_77, %c0_78] : memref<27x8x16xf32, #tpu.memory_space<vmem>>, vector<1x8x16xf32>
    %101 = vector.shape_cast %100 : vector<1x8x16xf32> to vector<8x16xf32>
    %c11_79 = arith.constant 11 : index
    %c0_80 = arith.constant 0 : index
    %c0_81 = arith.constant 0 : index
    %102 = vector.load %arg4[%c11_79, %c0_80, %c0_81] : memref<27x8x256xf32, #tpu.memory_space<vmem>>, vector<1x8x256xf32>
    %103 = vector.shape_cast %102 : vector<1x8x256xf32> to vector<8x256xf32>
    %c7_i32 = arith.constant 7 : i32
    %104 = tpu.dynamic_rotate %10 by %c7_i32 dim 1 : vector<16x256xf32>, i32 -> vector<16x256xf32>
    %cst_82 = arith.constant dense<0.000000e+00> : vector<8x256xf32>
    %105 = tpu.matmul %101, %104, %cst_82 {dimension_numbers = #tpu.dot_dimension_numbers<[1], [0], [0], [1], [0, 0, 1, 1], [], []>} : vector<8x16xf32>, vector<16x256xf32>, vector<8x256xf32> -> vector<8x256xf32>
    %106 = arith.mulf %105, %103 : vector<8x256xf32>
    %107 = arith.addf %99, %106 : vector<8x256xf32>
    %c12 = arith.constant 12 : index
    %c0_83 = arith.constant 0 : index
    %c0_84 = arith.constant 0 : index
    %108 = vector.load %arg5[%c12, %c0_83, %c0_84] : memref<27x8x16xf32, #tpu.memory_space<vmem>>, vector<1x8x16xf32>
    %109 = vector.shape_cast %108 : vector<1x8x16xf32> to vector<8x16xf32>
    %c12_85 = arith.constant 12 : index
    %c0_86 = arith.constant 0 : index
    %c0_87 = arith.constant 0 : index
    %110 = vector.load %arg4[%c12_85, %c0_86, %c0_87] : memref<27x8x256xf32, #tpu.memory_space<vmem>>, vector<1x8x256xf32>
    %111 = vector.shape_cast %110 : vector<1x8x256xf32> to vector<8x256xf32>
    %c1_i32 = arith.constant 1 : i32
    %112 = tpu.dynamic_rotate %10 by %c1_i32 dim 1 : vector<16x256xf32>, i32 -> vector<16x256xf32>
    %cst_88 = arith.constant dense<0.000000e+00> : vector<8x256xf32>
    %113 = tpu.matmul %109, %112, %cst_88 {dimension_numbers = #tpu.dot_dimension_numbers<[1], [0], [0], [1], [0, 0, 1, 1], [], []>} : vector<8x16xf32>, vector<16x256xf32>, vector<8x256xf32> -> vector<8x256xf32>
    %114 = arith.mulf %113, %111 : vector<8x256xf32>
    %115 = arith.addf %107, %114 : vector<8x256xf32>
    %c13 = arith.constant 13 : index
    %c0_89 = arith.constant 0 : index
    %c0_90 = arith.constant 0 : index
    %116 = vector.load %arg5[%c13, %c0_89, %c0_90] : memref<27x8x16xf32, #tpu.memory_space<vmem>>, vector<1x8x16xf32>
    %117 = vector.shape_cast %116 : vector<1x8x16xf32> to vector<8x16xf32>
    %c13_91 = arith.constant 13 : index
    %c0_92 = arith.constant 0 : index
    %c0_93 = arith.constant 0 : index
    %118 = vector.load %arg4[%c13_91, %c0_92, %c0_93] : memref<27x8x256xf32, #tpu.memory_space<vmem>>, vector<1x8x256xf32>
    %119 = vector.shape_cast %118 : vector<1x8x256xf32> to vector<8x256xf32>
    %cst_94 = arith.constant dense<0.000000e+00> : vector<8x256xf32>
    %120 = tpu.matmul %117, %10, %cst_94 {dimension_numbers = #tpu.dot_dimension_numbers<[1], [0], [0], [1], [0, 0, 1, 1], [], []>} : vector<8x16xf32>, vector<16x256xf32>, vector<8x256xf32> -> vector<8x256xf32>
    %121 = arith.mulf %120, %119 : vector<8x256xf32>
    %122 = arith.addf %115, %121 : vector<8x256xf32>
    %c14 = arith.constant 14 : index
    %c0_95 = arith.constant 0 : index
    %c0_96 = arith.constant 0 : index
    %123 = vector.load %arg5[%c14, %c0_95, %c0_96] : memref<27x8x16xf32, #tpu.memory_space<vmem>>, vector<1x8x16xf32>
    %124 = vector.shape_cast %123 : vector<1x8x16xf32> to vector<8x16xf32>
    %c14_97 = arith.constant 14 : index
    %c0_98 = arith.constant 0 : index
    %c0_99 = arith.constant 0 : index
    %125 = vector.load %arg4[%c14_97, %c0_98, %c0_99] : memref<27x8x256xf32, #tpu.memory_space<vmem>>, vector<1x8x256xf32>
    %126 = vector.shape_cast %125 : vector<1x8x256xf32> to vector<8x256xf32>
    %c255_i32 = arith.constant 255 : i32
    %127 = tpu.dynamic_rotate %10 by %c255_i32 dim 1 : vector<16x256xf32>, i32 -> vector<16x256xf32>
    %cst_100 = arith.constant dense<0.000000e+00> : vector<8x256xf32>
    %128 = tpu.matmul %124, %127, %cst_100 {dimension_numbers = #tpu.dot_dimension_numbers<[1], [0], [0], [1], [0, 0, 1, 1], [], []>} : vector<8x16xf32>, vector<16x256xf32>, vector<8x256xf32> -> vector<8x256xf32>
    %129 = arith.mulf %128, %126 : vector<8x256xf32>
    %130 = arith.addf %122, %129 : vector<8x256xf32>
    %c15 = arith.constant 15 : index
    %c0_101 = arith.constant 0 : index
    %c0_102 = arith.constant 0 : index
    %131 = vector.load %arg5[%c15, %c0_101, %c0_102] : memref<27x8x16xf32, #tpu.memory_space<vmem>>, vector<1x8x16xf32>
    %132 = vector.shape_cast %131 : vector<1x8x16xf32> to vector<8x16xf32>
    %c15_103 = arith.constant 15 : index
    %c0_104 = arith.constant 0 : index
    %c0_105 = arith.constant 0 : index
    %133 = vector.load %arg4[%c15_103, %c0_104, %c0_105] : memref<27x8x256xf32, #tpu.memory_space<vmem>>, vector<1x8x256xf32>
    %134 = vector.shape_cast %133 : vector<1x8x256xf32> to vector<8x256xf32>
    %c249_i32 = arith.constant 249 : i32
    %135 = tpu.dynamic_rotate %10 by %c249_i32 dim 1 : vector<16x256xf32>, i32 -> vector<16x256xf32>
    %cst_106 = arith.constant dense<0.000000e+00> : vector<8x256xf32>
    %136 = tpu.matmul %132, %135, %cst_106 {dimension_numbers = #tpu.dot_dimension_numbers<[1], [0], [0], [1], [0, 0, 1, 1], [], []>} : vector<8x16xf32>, vector<16x256xf32>, vector<8x256xf32> -> vector<8x256xf32>
    %137 = arith.mulf %136, %134 : vector<8x256xf32>
    %138 = arith.addf %130, %137 : vector<8x256xf32>
    %c16 = arith.constant 16 : index
    %c0_107 = arith.constant 0 : index
    %c0_108 = arith.constant 0 : index
    %139 = vector.load %arg5[%c16, %c0_107, %c0_108] : memref<27x8x16xf32, #tpu.memory_space<vmem>>, vector<1x8x16xf32>
    %140 = vector.shape_cast %139 : vector<1x8x16xf32> to vector<8x16xf32>
    %c16_109 = arith.constant 16 : index
    %c0_110 = arith.constant 0 : index
    %c0_111 = arith.constant 0 : index
    %141 = vector.load %arg4[%c16_109, %c0_110, %c0_111] : memref<27x8x256xf32, #tpu.memory_space<vmem>>, vector<1x8x256xf32>
    %142 = vector.shape_cast %141 : vector<1x8x256xf32> to vector<8x256xf32>
    %c248_i32 = arith.constant 248 : i32
    %143 = tpu.dynamic_rotate %10 by %c248_i32 dim 1 : vector<16x256xf32>, i32 -> vector<16x256xf32>
    %cst_112 = arith.constant dense<0.000000e+00> : vector<8x256xf32>
    %144 = tpu.matmul %140, %143, %cst_112 {dimension_numbers = #tpu.dot_dimension_numbers<[1], [0], [0], [1], [0, 0, 1, 1], [], []>} : vector<8x16xf32>, vector<16x256xf32>, vector<8x256xf32> -> vector<8x256xf32>
    %145 = arith.mulf %144, %142 : vector<8x256xf32>
    %146 = arith.addf %138, %145 : vector<8x256xf32>
    %c17 = arith.constant 17 : index
    %c0_113 = arith.constant 0 : index
    %c0_114 = arith.constant 0 : index
    %147 = vector.load %arg5[%c17, %c0_113, %c0_114] : memref<27x8x16xf32, #tpu.memory_space<vmem>>, vector<1x8x16xf32>
    %148 = vector.shape_cast %147 : vector<1x8x16xf32> to vector<8x16xf32>
    %c17_115 = arith.constant 17 : index
    %c0_116 = arith.constant 0 : index
    %c0_117 = arith.constant 0 : index
    %149 = vector.load %arg4[%c17_115, %c0_116, %c0_117] : memref<27x8x256xf32, #tpu.memory_space<vmem>>, vector<1x8x256xf32>
    %150 = vector.shape_cast %149 : vector<1x8x256xf32> to vector<8x256xf32>
    %c247_i32 = arith.constant 247 : i32
    %151 = tpu.dynamic_rotate %10 by %c247_i32 dim 1 : vector<16x256xf32>, i32 -> vector<16x256xf32>
    %cst_118 = arith.constant dense<0.000000e+00> : vector<8x256xf32>
    %152 = tpu.matmul %148, %151, %cst_118 {dimension_numbers = #tpu.dot_dimension_numbers<[1], [0], [0], [1], [0, 0, 1, 1], [], []>} : vector<8x16xf32>, vector<16x256xf32>, vector<8x256xf32> -> vector<8x256xf32>
    %153 = arith.mulf %152, %150 : vector<8x256xf32>
    %154 = arith.addf %146, %153 : vector<8x256xf32>
    %c18 = arith.constant 18 : index
    %c0_119 = arith.constant 0 : index
    %c0_120 = arith.constant 0 : index
    %155 = vector.load %arg5[%c18, %c0_119, %c0_120] : memref<27x8x16xf32, #tpu.memory_space<vmem>>, vector<1x8x16xf32>
    %156 = vector.shape_cast %155 : vector<1x8x16xf32> to vector<8x16xf32>
    %c18_121 = arith.constant 18 : index
    %c0_122 = arith.constant 0 : index
    %c0_123 = arith.constant 0 : index
    %157 = vector.load %arg4[%c18_121, %c0_122, %c0_123] : memref<27x8x256xf32, #tpu.memory_space<vmem>>, vector<1x8x256xf32>
    %158 = vector.shape_cast %157 : vector<1x8x256xf32> to vector<8x256xf32>
    %c201_i32 = arith.constant 201 : i32
    %159 = tpu.dynamic_rotate %10 by %c201_i32 dim 1 : vector<16x256xf32>, i32 -> vector<16x256xf32>
    %cst_124 = arith.constant dense<0.000000e+00> : vector<8x256xf32>
    %160 = tpu.matmul %156, %159, %cst_124 {dimension_numbers = #tpu.dot_dimension_numbers<[1], [0], [0], [1], [0, 0, 1, 1], [], []>} : vector<8x16xf32>, vector<16x256xf32>, vector<8x256xf32> -> vector<8x256xf32>
    %161 = arith.mulf %160, %158 : vector<8x256xf32>
    %162 = arith.addf %154, %161 : vector<8x256xf32>
    %c19 = arith.constant 19 : index
    %c0_125 = arith.constant 0 : index
    %c0_126 = arith.constant 0 : index
    %163 = vector.load %arg5[%c19, %c0_125, %c0_126] : memref<27x8x16xf32, #tpu.memory_space<vmem>>, vector<1x8x16xf32>
    %164 = vector.shape_cast %163 : vector<1x8x16xf32> to vector<8x16xf32>
    %c19_127 = arith.constant 19 : index
    %c0_128 = arith.constant 0 : index
    %c0_129 = arith.constant 0 : index
    %165 = vector.load %arg4[%c19_127, %c0_128, %c0_129] : memref<27x8x256xf32, #tpu.memory_space<vmem>>, vector<1x8x256xf32>
    %166 = vector.shape_cast %165 : vector<1x8x256xf32> to vector<8x256xf32>
    %c200_i32 = arith.constant 200 : i32
    %167 = tpu.dynamic_rotate %10 by %c200_i32 dim 1 : vector<16x256xf32>, i32 -> vector<16x256xf32>
    %cst_130 = arith.constant dense<0.000000e+00> : vector<8x256xf32>
    %168 = tpu.matmul %164, %167, %cst_130 {dimension_numbers = #tpu.dot_dimension_numbers<[1], [0], [0], [1], [0, 0, 1, 1], [], []>} : vector<8x16xf32>, vector<16x256xf32>, vector<8x256xf32> -> vector<8x256xf32>
    %169 = arith.mulf %168, %166 : vector<8x256xf32>
    %170 = arith.addf %162, %169 : vector<8x256xf32>
    %c20 = arith.constant 20 : index
    %c0_131 = arith.constant 0 : index
    %c0_132 = arith.constant 0 : index
    %171 = vector.load %arg5[%c20, %c0_131, %c0_132] : memref<27x8x16xf32, #tpu.memory_space<vmem>>, vector<1x8x16xf32>
    %172 = vector.shape_cast %171 : vector<1x8x16xf32> to vector<8x16xf32>
    %c20_133 = arith.constant 20 : index
    %c0_134 = arith.constant 0 : index
    %c0_135 = arith.constant 0 : index
    %173 = vector.load %arg4[%c20_133, %c0_134, %c0_135] : memref<27x8x256xf32, #tpu.memory_space<vmem>>, vector<1x8x256xf32>
    %174 = vector.shape_cast %173 : vector<1x8x256xf32> to vector<8x256xf32>
    %c199_i32 = arith.constant 199 : i32
    %175 = tpu.dynamic_rotate %10 by %c199_i32 dim 1 : vector<16x256xf32>, i32 -> vector<16x256xf32>
    %cst_136 = arith.constant dense<0.000000e+00> : vector<8x256xf32>
    %176 = tpu.matmul %172, %175, %cst_136 {dimension_numbers = #tpu.dot_dimension_numbers<[1], [0], [0], [1], [0, 0, 1, 1], [], []>} : vector<8x16xf32>, vector<16x256xf32>, vector<8x256xf32> -> vector<8x256xf32>
    %177 = arith.mulf %176, %174 : vector<8x256xf32>
    %178 = arith.addf %170, %177 : vector<8x256xf32>
    %c21 = arith.constant 21 : index
    %c0_137 = arith.constant 0 : index
    %c0_138 = arith.constant 0 : index
    %179 = vector.load %arg5[%c21, %c0_137, %c0_138] : memref<27x8x16xf32, #tpu.memory_space<vmem>>, vector<1x8x16xf32>
    %180 = vector.shape_cast %179 : vector<1x8x16xf32> to vector<8x16xf32>
    %c21_139 = arith.constant 21 : index
    %c0_140 = arith.constant 0 : index
    %c0_141 = arith.constant 0 : index
    %181 = vector.load %arg4[%c21_139, %c0_140, %c0_141] : memref<27x8x256xf32, #tpu.memory_space<vmem>>, vector<1x8x256xf32>
    %182 = vector.shape_cast %181 : vector<1x8x256xf32> to vector<8x256xf32>
    %c193_i32 = arith.constant 193 : i32
    %183 = tpu.dynamic_rotate %10 by %c193_i32 dim 1 : vector<16x256xf32>, i32 -> vector<16x256xf32>
    %cst_142 = arith.constant dense<0.000000e+00> : vector<8x256xf32>
    %184 = tpu.matmul %180, %183, %cst_142 {dimension_numbers = #tpu.dot_dimension_numbers<[1], [0], [0], [1], [0, 0, 1, 1], [], []>} : vector<8x16xf32>, vector<16x256xf32>, vector<8x256xf32> -> vector<8x256xf32>
    %185 = arith.mulf %184, %182 : vector<8x256xf32>
    %186 = arith.addf %178, %185 : vector<8x256xf32>
    %c22 = arith.constant 22 : index
    %c0_143 = arith.constant 0 : index
    %c0_144 = arith.constant 0 : index
    %187 = vector.load %arg5[%c22, %c0_143, %c0_144] : memref<27x8x16xf32, #tpu.memory_space<vmem>>, vector<1x8x16xf32>
    %188 = vector.shape_cast %187 : vector<1x8x16xf32> to vector<8x16xf32>
    %c22_145 = arith.constant 22 : index
    %c0_146 = arith.constant 0 : index
    %c0_147 = arith.constant 0 : index
    %189 = vector.load %arg4[%c22_145, %c0_146, %c0_147] : memref<27x8x256xf32, #tpu.memory_space<vmem>>, vector<1x8x256xf32>
    %190 = vector.shape_cast %189 : vector<1x8x256xf32> to vector<8x256xf32>
    %c192_i32 = arith.constant 192 : i32
    %191 = tpu.dynamic_rotate %10 by %c192_i32 dim 1 : vector<16x256xf32>, i32 -> vector<16x256xf32>
    %cst_148 = arith.constant dense<0.000000e+00> : vector<8x256xf32>
    %192 = tpu.matmul %188, %191, %cst_148 {dimension_numbers = #tpu.dot_dimension_numbers<[1], [0], [0], [1], [0, 0, 1, 1], [], []>} : vector<8x16xf32>, vector<16x256xf32>, vector<8x256xf32> -> vector<8x256xf32>
    %193 = arith.mulf %192, %190 : vector<8x256xf32>
    %194 = arith.addf %186, %193 : vector<8x256xf32>
    %c23 = arith.constant 23 : index
    %c0_149 = arith.constant 0 : index
    %c0_150 = arith.constant 0 : index
    %195 = vector.load %arg5[%c23, %c0_149, %c0_150] : memref<27x8x16xf32, #tpu.memory_space<vmem>>, vector<1x8x16xf32>
    %196 = vector.shape_cast %195 : vector<1x8x16xf32> to vector<8x16xf32>
    %c23_151 = arith.constant 23 : index
    %c0_152 = arith.constant 0 : index
    %c0_153 = arith.constant 0 : index
    %197 = vector.load %arg4[%c23_151, %c0_152, %c0_153] : memref<27x8x256xf32, #tpu.memory_space<vmem>>, vector<1x8x256xf32>
    %198 = vector.shape_cast %197 : vector<1x8x256xf32> to vector<8x256xf32>
    %c191_i32 = arith.constant 191 : i32
    %199 = tpu.dynamic_rotate %10 by %c191_i32 dim 1 : vector<16x256xf32>, i32 -> vector<16x256xf32>
    %cst_154 = arith.constant dense<0.000000e+00> : vector<8x256xf32>
    %200 = tpu.matmul %196, %199, %cst_154 {dimension_numbers = #tpu.dot_dimension_numbers<[1], [0], [0], [1], [0, 0, 1, 1], [], []>} : vector<8x16xf32>, vector<16x256xf32>, vector<8x256xf32> -> vector<8x256xf32>
    %201 = arith.mulf %200, %198 : vector<8x256xf32>
    %202 = arith.addf %194, %201 : vector<8x256xf32>
    %c24 = arith.constant 24 : index
    %c0_155 = arith.constant 0 : index
    %c0_156 = arith.constant 0 : index
    %203 = vector.load %arg5[%c24, %c0_155, %c0_156] : memref<27x8x16xf32, #tpu.memory_space<vmem>>, vector<1x8x16xf32>
    %204 = vector.shape_cast %203 : vector<1x8x16xf32> to vector<8x16xf32>
    %c24_157 = arith.constant 24 : index
    %c0_158 = arith.constant 0 : index
    %c0_159 = arith.constant 0 : index
    %205 = vector.load %arg4[%c24_157, %c0_158, %c0_159] : memref<27x8x256xf32, #tpu.memory_space<vmem>>, vector<1x8x256xf32>
    %206 = vector.shape_cast %205 : vector<1x8x256xf32> to vector<8x256xf32>
    %c185_i32 = arith.constant 185 : i32
    %207 = tpu.dynamic_rotate %10 by %c185_i32 dim 1 : vector<16x256xf32>, i32 -> vector<16x256xf32>
    %cst_160 = arith.constant dense<0.000000e+00> : vector<8x256xf32>
    %208 = tpu.matmul %204, %207, %cst_160 {dimension_numbers = #tpu.dot_dimension_numbers<[1], [0], [0], [1], [0, 0, 1, 1], [], []>} : vector<8x16xf32>, vector<16x256xf32>, vector<8x256xf32> -> vector<8x256xf32>
    %209 = arith.mulf %208, %206 : vector<8x256xf32>
    %210 = arith.addf %202, %209 : vector<8x256xf32>
    %c25 = arith.constant 25 : index
    %c0_161 = arith.constant 0 : index
    %c0_162 = arith.constant 0 : index
    %211 = vector.load %arg5[%c25, %c0_161, %c0_162] : memref<27x8x16xf32, #tpu.memory_space<vmem>>, vector<1x8x16xf32>
    %212 = vector.shape_cast %211 : vector<1x8x16xf32> to vector<8x16xf32>
    %c25_163 = arith.constant 25 : index
    %c0_164 = arith.constant 0 : index
    %c0_165 = arith.constant 0 : index
    %213 = vector.load %arg4[%c25_163, %c0_164, %c0_165] : memref<27x8x256xf32, #tpu.memory_space<vmem>>, vector<1x8x256xf32>
    %214 = vector.shape_cast %213 : vector<1x8x256xf32> to vector<8x256xf32>
    %c184_i32 = arith.constant 184 : i32
    %215 = tpu.dynamic_rotate %10 by %c184_i32 dim 1 : vector<16x256xf32>, i32 -> vector<16x256xf32>
    %cst_166 = arith.constant dense<0.000000e+00> : vector<8x256xf32>
    %216 = tpu.matmul %212, %215, %cst_166 {dimension_numbers = #tpu.dot_dimension_numbers<[1], [0], [0], [1], [0, 0, 1, 1], [], []>} : vector<8x16xf32>, vector<16x256xf32>, vector<8x256xf32> -> vector<8x256xf32>
    %217 = arith.mulf %216, %214 : vector<8x256xf32>
    %218 = arith.addf %210, %217 : vector<8x256xf32>
    %c26 = arith.constant 26 : index
    %c0_167 = arith.constant 0 : index
    %c0_168 = arith.constant 0 : index
    %219 = vector.load %arg5[%c26, %c0_167, %c0_168] : memref<27x8x16xf32, #tpu.memory_space<vmem>>, vector<1x8x16xf32>
    %220 = vector.shape_cast %219 : vector<1x8x16xf32> to vector<8x16xf32>
    %c26_169 = arith.constant 26 : index
    %c0_170 = arith.constant 0 : index
    %c0_171 = arith.constant 0 : index
    %221 = vector.load %arg4[%c26_169, %c0_170, %c0_171] : memref<27x8x256xf32, #tpu.memory_space<vmem>>, vector<1x8x256xf32>
    %222 = vector.shape_cast %221 : vector<1x8x256xf32> to vector<8x256xf32>
    %c183_i32 = arith.constant 183 : i32
    %223 = tpu.dynamic_rotate %10 by %c183_i32 dim 1 : vector<16x256xf32>, i32 -> vector<16x256xf32>
    %cst_172 = arith.constant dense<0.000000e+00> : vector<8x256xf32>
    %224 = tpu.matmul %220, %223, %cst_172 {dimension_numbers = #tpu.dot_dimension_numbers<[1], [0], [0], [1], [0, 0, 1, 1], [], []>} : vector<8x16xf32>, vector<16x256xf32>, vector<8x256xf32> -> vector<8x256xf32>
    %225 = arith.mulf %224, %222 : vector<8x256xf32>
    %226 = arith.addf %218, %225 : vector<8x256xf32>
    %c0_173 = arith.constant 0 : index
    %c0_174 = arith.constant 0 : index
    %c0_175 = arith.constant 0 : index
    %227 = vector.load %arg6[%c0_173, %c0_174, %c0_175] : memref<1x16x256xf32, #tpu.memory_space<vmem>>, vector<1x8x256xf32>
    %228 = vector.shape_cast %227 : vector<1x8x256xf32> to vector<8x256xf32>
    %229 = vector.shape_cast %1 : vector<8x256xf32> to vector<1x8x256xf32>
    tpu.vector_store %arg6[%c0_173, %c0_174, %c0_175], %229 {strides = array<i32>} : memref<1x16x256xf32, #tpu.memory_space<vmem>>, vector<1x8x256xf32>,
    %c0_176 = arith.constant 0 : index
    %c8_177 = arith.constant 8 : index
    %c0_178 = arith.constant 0 : index
    %230 = vector.load %arg6[%c0_176, %c8_177, %c0_178] : memref<1x16x256xf32, #tpu.memory_space<vmem>>, vector<1x8x256xf32>
    %231 = vector.shape_cast %230 : vector<1x8x256xf32> to vector<8x256xf32>
    %232 = vector.shape_cast %226 : vector<8x256xf32> to vector<1x8x256xf32>
    tpu.vector_store %arg6[%c0_176, %c8_177, %c0_178], %232 {strides = array<i32>} : memref<1x16x256xf32, #tpu.memory_space<vmem>>, vector<1x8x256xf32>,
    return
  }
  func.func @transform_0(%arg0: i32) -> (i32, i32, i32) {
    %c0_i32 = arith.constant 0 : i32
    %c0_i32_0 = arith.constant 0 : i32
    %c0_i32_1 = arith.constant 0 : i32
    return %arg0, %c0_i32, %c0_i32_0 : i32, i32, i32
  }
  func.func @transform_1(%arg0: i32) -> (i32, i32, i32) {
    %c0_i32 = arith.constant 0 : i32
    %c0_i32_0 = arith.constant 0 : i32
    %c0_i32_1 = arith.constant 0 : i32
    return %arg0, %c0_i32, %c0_i32_0 : i32, i32, i32
  }
  func.func @transform_2(%arg0: i32) -> (i32, i32, i32) {
    %c0_i32 = arith.constant 0 : i32
    %c0_i32_0 = arith.constant 0 : i32
    %c0_i32_1 = arith.constant 0 : i32
    return %arg0, %c0_i32, %c0_i32_0 : i32, i32, i32
  }
  func.func @transform_3(%arg0: i32) -> (i32, i32, i32) {
    %c0_i32 = arith.constant 0 : i32
    %c0_i32_0 = arith.constant 0 : i32
    %c0_i32_1 = arith.constant 0 : i32
    %c0_i32_2 = arith.constant 0 : i32
    return %c0_i32, %c0_i32_0, %c0_i32_1 : i32, i32, i32
  }
  func.func @transform_4(%arg0: i32) -> (i32, i32, i32) {
    %c0_i32 = arith.constant 0 : i32
    %c0_i32_0 = arith.constant 0 : i32
    %c0_i32_1 = arith.constant 0 : i32
    %c0_i32_2 = arith.constant 0 : i32
    return %c0_i32, %c0_i32_0, %c0_i32_1 : i32, i32, i32
  }
  func.func @transform_5(%arg0: i32) -> (i32, i32, i32) {
    %c0_i32 = arith.constant 0 : i32
    %c0_i32_0 = arith.constant 0 : i32
    %c0_i32_1 = arith.constant 0 : i32
    return %arg0, %c0_i32, %c0_i32_0 : i32, i32, i32
  }
}

</mosaic_0001>

<bundles_post_ra>
// kernel: dense_layer_forward.1
= control target key start
LH: loop header
LB: loop body
LE: loop exit
PB: predicated region body
PF: predicated region fallthrough
CT: control target
= control target key end

     0   :  { %s3404_s18 = smov 0   ;;  %s3853_s0 = inlined_call_operand.vmem [shape: f32[2,8,256], index: 0, kind: input, shape index: {}]   ;;  %s3854_s1 = inlined_call_operand.vmem [shape: f32[2,16,8], index: 1, kind: input, shape index: {}]   ;;  %s3855_s2 = inlined_call_operand.vmem [shape: f32[2,16,1], index: 2, kind: input, shape index: {}]   ;;  %s3856_s3 = inlined_call_operand.vmem [shape: f32[27,8,256], index: 3, kind: input, shape index: {}]   ;;  %s3857_s4 = inlined_call_operand.vmem [shape: f32[27,8,16], index: 4, kind: input, shape index: {}]   ;;  %s3858_s5 = inlined_call_operand.vmem [shape: f32[2,16,256], index: 5, kind: output, shape index: {}]  }
   0x1 LB: > { %s2915_s19 = sadd.s32 4294967295, %s3353_s18   ;;  %p2919_p0 = scmp.ge.s32.totalorder %s3353_s18, 1  ;;  %s3353_s18 = sphi %s3404_s18, %s15_s18  }
   0x2   : > { %p207_p1 = scmp.lt.s32.totalorder %s3353_s18, 3 }
   0x4   : > { %p208_p2 = pnand %p2919_p0, %p207_p1 }
   0x5   : > { %p245_p3 = scmp.lt.s32.totalorder (!%p208_p2), %s2915_s19, 1  ;;  %v3355_v0 = vmov (!%p208_p2), 0.0   ;;  %v3356_v1 = vmov (!%p208_p2), 0   ;;  %vm281_vm0 = vcmask (!%p208_p2), 64512   ;;  %s3357_s9 = smov (!%p208_p2), 72   ;;  %v380_v26 = vlaneseq (!%p208_p2)  ;;  %v369_v52 = vld [vmem:[%s3857_s4] sm:$0xff] (!%p208_p2) }
   0x6   : > { %211 = sbr.rel (%p208_p2) target bundleno = 669 (0x29d), region = 40  ;;  %352 = vmatprep.mubr.f32.mxu0 (!%p208_p2), %v3355_v0  ;;  %3176 = vset.pattern.permute.xlu0 (!%p208_p2), %v3356_v1  ;;  %s3358_s10 = smov (!%p208_p2), 73   ;;  %vm387_vm3 = vcmask (!%p208_p2), 130048  }
   0x7   : > { %455 = vmatprep.mubr.f32.mxu1 (!%p208_p2), %v3355_v0  ;;  %s3359_s11 = smov (!%p208_p2), 71   ;;  %s3360_s12 = smov (!%p208_p2), 65   ;;  %v3436_v29 = vand.u32 (!%p208_p2), 127, %v380_v26 }
   0x8   : > { %s3361_s13 = smov (!%p208_p2), 64   ;;  %s3362_s14 = smov (!%p208_p2), 63  }
   0x9   : > { %s3363_s15 = smov (!%p208_p2), 57   ;;  %s3364_s16 = smov (!%p208_p2), 56   ;;  %vm382_vm1 = vcmp.lt.s32.totalorder (!%p208_p2), %v3436_v29, 73  ;;  %vm479_vm2 = vcmp.lt.s32.totalorder (!%p208_p2), %v3436_v29, 72  ;;  %vm575_vm4 = vcmp.lt.s32.totalorder (!%p208_p2), %v3436_v29, 71  ;;  %vm671_vm5 = vcmp.lt.s32.totalorder (!%p208_p2), %v3436_v29, 65 }
   0xa   : > { %s3365_s17 = smov (!%p208_p2), 55   ;;  %s3369_s22 = smov (!%p208_p2), 1   ;;  %vm767_vm6 = vcmp.lt.s32.totalorder (!%p208_p2), %v3436_v29, 64  ;;  %vm863_vm7 = vcmp.lt.s32.totalorder (!%p208_p2), %v3436_v29, 63  ;;  %vm959_vm8 = vcmp.lt.s32.totalorder (!%p208_p2), %v3436_v29, 57  ;;  %vm1055_vm9 = vcmp.lt.s32.totalorder (!%p208_p2), %v3436_v29, 56 }
   0xb   : > { %s3370_s23 = smov (!%p208_p2), 127   ;;  %s3372_s25 = smov (!%p208_p2), 120   ;;  %vm1151_vm10 = vcmp.lt.s32.totalorder (!%p208_p2), %v3436_v29, 55  ;;  %vm1247_vm11 = vcmp.lt.s32.totalorder (!%p208_p2), %v3436_v29, 9  ;;  %vm1343_vm12 = vcmp.lt.s32.totalorder (!%p208_p2), %v3436_v29, 8  ;;  %vm1439_vm13 = vcmp.lt.s32.totalorder (!%p208_p2), %v3436_v29, 7 }
   0xc   : > { %s3373_s26 = smov (!%p208_p2), 119   ;;  %vm1535_vm14 = vcmp.lt.s32.totalorder (!%p208_p2), %v3436_v29, 1  ;;  %vm1714_vm15 = vcmp.lt.s32.totalorder (!%p208_p2), %v3436_v29, 127 }
   0xd   : > { %s3860_s19 = smov (!%p245_p3, %s2915_s19), 1 }
   0xe   : > { %s3037_s20 = sshll.u32 %s3860_s19, 4  ;;  %s3040_s21 = sshll.u32 %s3860_s19, 5 }
   0xf   : > { %s249_s24 = scalar_lea.vmem %s3853_s0, %s3037_s20  ;;  %s3420_s27 = scalar_lea.vmem %s3858_s5, %s3040_s21 }
  0x10   : > { %v266_v2 = vld [vmem:[%s249_s24 + $0x8] sm:$0xff]  ;;  %v265_v3 = vld [vmem:[%s249_s24] sm:$0xff]  ;;  %s254_s30 = scalar_lea.vmem %s3854_s1, %s3037_s20  ;;  %s259_s8 = scalar_lea.vmem %s3855_s2, %s3037_s20 }
  0x11   : > { %288 = vmatprep.subr.mxu0 %v266_v2  ;;  %2833 = vst [vmem:[%s3420_s27 + $0x8] sm:$0xff] %v266_v2  ;;  %2832 = vst [vmem:[%s3420_s27] sm:$0xff] %v265_v3  ;;  %v267_v4 = vld [vmem:[%s254_s30] sm:$0xff]  ;;  %v270_v6 = vld [vmem:[%s259_s8 + $0x8] sm:$0xff]  ;;  %s3366_s19 = smov 9   ;;  %s3367_s20 = smov 8  }
  0x12   : > { %v269_v5 = vld [vmem:[%s259_s8] sm:$0xff]  ;;  %289 = vmatpush1.msra.mxu0 %v265_v3  ;;  %v268_v7 = vld [vmem:[%s254_s30 + $0x8] sm:$0xff]  ;;  %s3368_s21 = smov 7   ;;  %s3371_s24 = smov 121  }
  0x13   : > { %273 = vperm.xlu0 %3176, %v269_v5   ;;  %2928 = vmatmul.mubr.msk.f32.vlgmr.msra.gmra.mrb[0].mxu0 %vm281_vm0, %v267_v4  ;;  %v2931_v2 = vld [vmem:[%s3857_s4 + $0x8] sm:$0xff] }
  0x14   : > { %358 = vmatprep.mubr.f32.mxu0 %v3355_v0 }
  0x17   : > { %278 = vperm.xlu0 %3176, %v270_v6   ;;  %2929 = vmatmul.mubr.msk.f32.gmra.mrb[2].mxu0 %vm281_vm0, %v268_v7  ;;  %vm1810_vm0 = vcmp.lt.s32.totalorder %v3436_v29, 121 }
  0x18   : > { %647 = vmatprep.mubr.f32.mxu0 %v3355_v0 }
  0x92   : > { %v274_v8 = vpop.permute.xlu0 %273 }
  0x96   : > { %v279_v12 = vpop.permute.xlu0 %278 }
  0xe6   : > { %v354_v9 = vpop.f32.mrb[0].mxu0 }
  0xe7   : > { %v356_v10 = vpop.f32.mrb[1].mxu0  ;;  %v355_v11 = vadd.f32 %v354_v9, %v274_v8 }
  0xe8   : > { %v357_v13 = vadd.f32 %v356_v10, %v274_v8 }
  0xe9   : > { %v365_v18 = vmax.f32 %v355_v11, 0.0 }
  0xea   : > { %v360_v14 = vpop.f32.mrb[2].mxu0  ;;  %v366_v20 = vmax.f32 %v357_v13, 0.0 }
  0xeb   : > { %v361_v15 = vadd.f32 %v360_v14, %v279_v12  ;;  %v362_v16 = vpop.f32.mrb[3].mxu0 }
  0xec   : > { %v363_v17 = vadd.f32 %v362_v16, %v279_v12 }
  0xed   : > { %v367_v19 = vmax.f32 %v361_v15, 0.0  ;;  %v2935_v15 = vld [vmem:[%s3857_s4 + $0x10] sm:$0xff] }
  0xee   : > { %v368_v21 = vmax.f32 %v363_v17, 0.0 }
  0xef   : > { %v3182_v22 = vpack.i.bf16 %v367_v19, %v365_v18  ;;  %v3434_v25 = vpack.c.bf16 %v367_v19, %v365_v18 }
  0xf0   : > { %v3257_v23 = vpack.i.bf16 %v368_v21, %v366_v20  ;;  %v3432_v24 = vpack.c.bf16 %v368_v21, %v366_v20 }
  0xf1   : > { %3183 = vrot.lane.b32.xlu0 %v3182_v22, %s3357_s9  ;;  %3178 = vrot.lane.b32.xlu1 %v3182_v22, %s3358_s10 }
  0xf5   : > { %3188 = vrot.lane.b32.xlu0 %v3182_v22, %s3359_s11  ;;  %3258 = vrot.lane.b32.xlu1 %v3257_v23, %s3358_s10 }
  0xf9   : > { %3193 = vrot.lane.b32.xlu0 %v3182_v22, %s3360_s12  ;;  %3263 = vrot.lane.b32.xlu1 %v3257_v23, %s3357_s9 }
  0xfd   : > { %3198 = vrot.lane.b32.xlu0 %v3182_v22, %s3361_s13  ;;  %3268 = vrot.lane.b32.xlu1 %v3257_v23, %s3359_s11 }
 0x101   : > { %3203 = vrot.lane.b32.xlu0 %v3182_v22, %s3362_s14  ;;  %3273 = vrot.lane.b32.xlu1 %v3257_v23, %s3360_s12 }
 0x105   : > { %3208 = vrot.lane.b32.xlu0 %v3182_v22, %s3363_s15  ;;  %3278 = vrot.lane.b32.xlu1 %v3257_v23, %s3361_s13 }
 0x109   : > { %3213 = vrot.lane.b32.xlu0 %v3182_v22, %s3364_s16  ;;  %3283 = vrot.lane.b32.xlu1 %v3257_v23, %s3362_s14 }
 0x10d   : > { %3218 = vrot.lane.b32.xlu0 %v3182_v22, %s3365_s17  ;;  %3288 = vrot.lane.b32.xlu1 %v3257_v23, %s3363_s15 }
 0x111   : > { %3223 = vrot.lane.b32.xlu0 %v3182_v22, %s3366_s19  ;;  %3293 = vrot.lane.b32.xlu1 %v3257_v23, %s3364_s16 }
 0x115   : > { %3228 = vrot.lane.b32.xlu0 %v3182_v22, %s3367_s20  ;;  %3298 = vrot.lane.b32.xlu1 %v3257_v23, %s3365_s17 }
 0x119   : > { %3233 = vrot.lane.b32.xlu0 %v3182_v22, %s3368_s21  ;;  %3303 = vrot.lane.b32.xlu1 %v3257_v23, %s3366_s19 }
 0x11d   : > { %3238 = vrot.lane.b32.xlu0 %v3182_v22, %s3369_s22  ;;  %3308 = vrot.lane.b32.xlu1 %v3257_v23, %s3367_s20 }
 0x121   : > { %3243 = vrot.lane.b32.xlu0 %v3182_v22, %s3370_s23  ;;  %3313 = vrot.lane.b32.xlu1 %v3257_v23, %s3368_s21 }
 0x125   : > { %3248 = vrot.lane.b32.xlu0 %v3182_v22, %s3371_s24  ;;  %3318 = vrot.lane.b32.xlu1 %v3257_v23, %s3369_s22 }
 0x129   : > { %3253 = vrot.lane.b32.xlu0 %v3182_v22, %s3372_s25  ;;  %3323 = vrot.lane.b32.xlu1 %v3257_v23, %s3370_s23 }
 0x12d   : > { %3338 = vrot.lane.b32.xlu0 %v3182_v22, %s3373_s26  ;;  %3328 = vrot.lane.b32.xlu1 %v3257_v23, %s3371_s24 }
 0x131   : > { %3333 = vrot.lane.b32.xlu1 %v3257_v23, %s3372_s25 }
 0x135   : > { %3343 = vrot.lane.b32.xlu1 %v3257_v23, %s3373_s26 }
 0x163   : > { %v3184_v27 = vpop.permute.xlu0 %3183  ;;  %v3179_v28 = vpop.permute.xlu1 %3178 }
 0x164   : > { %v3181_v32 = vunpack.i.h.bf16 %v3179_v28  ;;  %v3180_v33 = vunpack.i.l.bf16 %v3179_v28  ;;  %v3186_v44 = vunpack.i.h.bf16 %v3184_v27  ;;  %v3185_v45 = vunpack.i.l.bf16 %v3184_v27 }
 0x167   : > { %v3189_v30 = vpop.permute.xlu0 %3188  ;;  %v3259_v31 = vpop.permute.xlu1 %3258 }
 0x168   : > { %v3261_v34 = vunpack.i.h.bf16 %v3259_v31  ;;  %v3260_v35 = vunpack.i.l.bf16 %v3259_v31  ;;  %v3191_v57 = vunpack.i.h.bf16 %v3189_v30  ;;  %v3190_v58 = vunpack.i.l.bf16 %v3189_v30  ;;  %v2939_v31 = vld [vmem:[%s3857_s4 + $0x18] sm:$0xff] }
 0x16a   : > { %v383_v36 = vsel %vm382_vm1, %v3180_v33, %v3260_v35  ;;  %v384_v37 = vsel %vm382_vm1, %v3181_v32, %v3261_v34  ;;  %v385_v38 = vsel %vm382_vm1, %v3260_v35, %v3180_v33  ;;  %v386_v39 = vsel %vm382_vm1, %v3261_v34, %v3181_v32 }
 0x16b   : > { %v3194_v40 = vpop.permute.xlu0 %3193  ;;  %v3264_v41 = vpop.permute.xlu1 %3263  ;;  %v3440_v42 = vpack.c.bf16 %v384_v37, %v383_v36  ;;  %v3442_v43 = vpack.c.bf16 %v386_v39, %v385_v38  ;;  %vm1906_vm1 = vcmp.lt.s32.totalorder %v3436_v29, 120 }
 0x16c   : > { %v3266_v46 = vunpack.i.h.bf16 %v3264_v41  ;;  %v3265_v47 = vunpack.i.l.bf16 %v3264_v41  ;;  %v3196_v7 = vunpack.i.h.bf16 %v3194_v40  ;;  %v3195_v8 = vunpack.i.l.bf16 %v3194_v40 }
 0x16d   : > { %3042 = vmatprep.subr.bf16.mxu1 %v3440_v42 }
 0x16e   : > { %v483_v48 = vsel %vm479_vm2, %v3266_v46, %v3186_v44  ;;  %v482_v49 = vsel %vm479_vm2, %v3265_v47, %v3185_v45  ;;  %3044 = vmatpush1.bf16.msra.mxu1 %v3442_v43  ;;  %v480_v50 = vsel %vm479_vm2, %v3185_v45, %v3265_v47  ;;  %v481_v51 = vsel %vm479_vm2, %v3186_v44, %v3266_v46  ;;  %v2943_v46 = vld [vmem:[%s3857_s4 + $0x20] sm:$0xff] }
 0x16f   : > { %v3449_v53 = vpack.c.bf16 %v483_v48, %v482_v49  ;;  %v3199_v54 = vpop.permute.xlu0 %3198  ;;  %v3269_v55 = vpop.permute.xlu1 %3268  ;;  %v3452_v56 = vpack.c.bf16 %v481_v51, %v480_v50  ;;  %vm2002_vm2 = vcmp.lt.s32.totalorder %v3436_v29, 119  ;;  %v2999_v29 = vld [vmem:[%s3857_s4 + $0x90] sm:$0xff] }
 0x170   : > { %v3271_v59 = vunpack.i.h.bf16 %v3269_v55  ;;  %v3270_v60 = vunpack.i.l.bf16 %v3269_v55  ;;  %v3201_v20 = vunpack.i.h.bf16 %v3199_v54  ;;  %v3200_v21 = vunpack.i.l.bf16 %v3199_v54 }
 0x171   : > { %3046 = vmatprep.subr.bf16.mxu1 %v3452_v56  ;;  %2930 = vmatmul.mubr.msk.f32.vlgmr.msra.gmra.mrb[0].mxu1 %vm387_vm3, %v369_v52 }
 0x172   : > { %v579_v61 = vsel %vm575_vm4, %v3271_v59, %v3191_v57  ;;  %v578_v62 = vsel %vm575_vm4, %v3270_v60, %v3190_v58  ;;  %3048 = vmatpush1.bf16.msra.mxu1 %v3449_v53  ;;  %v576_v63 = vsel %vm575_vm4, %v3190_v58, %v3270_v60  ;;  %v577_v1 = vsel %vm575_vm4, %v3191_v57, %v3271_v59 }
 0x173   : > { %v3460_v3 = vpack.c.bf16 %v579_v61, %v578_v62  ;;  %v3204_v4 = vpop.permute.xlu0 %3203  ;;  %v3274_v5 = vpop.permute.xlu1 %3273  ;;  %v3463_v6 = vpack.c.bf16 %v577_v1, %v576_v63  ;;  %551 = vmatprep.mubr.f32.mxu1 %v3355_v0  ;;  %v2947_v61 = vld [vmem:[%s3857_s4 + $0x28] sm:$0xff] }
 0x174   : > { %v3276_v9 = vunpack.i.h.bf16 %v3274_v5  ;;  %v3275_v10 = vunpack.i.l.bf16 %v3274_v5  ;;  %v3206_v36 = vunpack.i.h.bf16 %v3204_v4  ;;  %v3205_v37 = vunpack.i.l.bf16 %v3204_v4 }
 0x175   : > { %3050 = vmatprep.subr.bf16.mxu0 %v3463_v6  ;;  %2934 = vmatmul.mubr.msk.f32.vlgmr.msra.gmra.mrb[2].mxu1 %vm387_vm3, %v2931_v2 }
 0x176   : > { %v675_v11 = vsel %vm671_vm5, %v3276_v9, %v3196_v7  ;;  %v674_v12 = vsel %vm671_vm5, %v3275_v10, %v3195_v8  ;;  %3052 = vmatpush1.bf16.msra.mxu0 %v3460_v3  ;;  %v672_v13 = vsel %vm671_vm5, %v3195_v8, %v3275_v10  ;;  %v673_v14 = vsel %vm671_vm5, %v3196_v7, %v3276_v9 }
 0x177   : > { %v3472_v16 = vpack.c.bf16 %v675_v11, %v674_v12  ;;  %v3209_v17 = vpop.permute.xlu0 %3208  ;;  %v3279_v18 = vpop.permute.xlu1 %3278  ;;  %v3475_v19 = vpack.c.bf16 %v673_v14, %v672_v13  ;;  %743 = vmatprep.mubr.f32.mxu1 %v3355_v0  ;;  %v2951_v13 = vld [vmem:[%s3857_s4 + $0x30] sm:$0xff] }
 0x178   : > { %v3281_v22 = vunpack.i.h.bf16 %v3279_v18  ;;  %v3280_v23 = vunpack.i.l.bf16 %v3279_v18  ;;  %v3211_v51 = vunpack.i.h.bf16 %v3209_v17  ;;  %v3210_v52 = vunpack.i.l.bf16 %v3209_v17 }
 0x179   : > { %3054 = vmatprep.subr.bf16.mxu1 %v3475_v19  ;;  %2938 = vmatmul.mubr.msk.f32.vlgmr.msra.gmra.mrb[4].mxu0 %vm387_vm3, %v2935_v15 }
 0x17a   : > { %v771_v26 = vsel %vm767_vm6, %v3281_v22, %v3201_v20  ;;  %v770_v27 = vsel %vm767_vm6, %v3280_v23, %v3200_v21  ;;  %3056 = vmatpush1.bf16.msra.mxu1 %v3472_v16  ;;  %v768_v28 = vsel %vm767_vm6, %v3200_v21, %v3280_v23  ;;  %v769_v30 = vsel %vm767_vm6, %v3201_v20, %v3281_v22 }
 0x17b   : > { %v3484_v32 = vpack.c.bf16 %v771_v26, %v770_v27  ;;  %v3214_v33 = vpop.permute.xlu0 %3213  ;;  %v3284_v34 = vpop.permute.xlu1 %3283  ;;  %v3487_v35 = vpack.c.bf16 %v769_v30, %v768_v28  ;;  %839 = vmatprep.mubr.f32.mxu0 %v3355_v0 }
 0x17c   : > { %v3286_v38 = vunpack.i.h.bf16 %v3284_v34  ;;  %v3285_v39 = vunpack.i.l.bf16 %v3284_v34  ;;  %v3216_v4 = vunpack.i.h.bf16 %v3214_v33  ;;  %v3215_v5 = vunpack.i.l.bf16 %v3214_v33 }
 0x17d   : > { %3058 = vmatprep.subr.bf16.mxu0 %v3487_v35  ;;  %2942 = vmatmul.mubr.msk.f32.vlgmr.msra.gmra.mrb[4].mxu1 %vm387_vm3, %v2939_v31  ;;  %v2955_v31 = vld [vmem:[%s3857_s4 + $0x38] sm:$0xff] }
 0x17e   : > { %v867_v40 = vsel %vm863_vm7, %v3286_v38, %v3206_v36  ;;  %v866_v41 = vsel %vm863_vm7, %v3285_v39, %v3205_v37  ;;  %3060 = vmatpush1.bf16.msra.mxu0 %v3484_v32  ;;  %v864_v44 = vsel %vm863_vm7, %v3205_v37, %v3285_v39  ;;  %v865_v45 = vsel %vm863_vm7, %v3206_v36, %v3286_v38 }
 0x17f   : > { %v3496_v47 = vpack.c.bf16 %v867_v40, %v866_v41  ;;  %v3219_v48 = vpop.permute.xlu0 %3218  ;;  %v3289_v49 = vpop.permute.xlu1 %3288  ;;  %v3499_v50 = vpack.c.bf16 %v865_v45, %v864_v44  ;;  %935 = vmatprep.mubr.f32.mxu1 %v3355_v0 }
 0x180   : > { %v3291_v54 = vunpack.i.h.bf16 %v3289_v49  ;;  %v3290_v55 = vunpack.i.l.bf16 %v3289_v49  ;;  %v3221_v20 = vunpack.i.h.bf16 %v3219_v48  ;;  %v3220_v21 = vunpack.i.l.bf16 %v3219_v48  ;;  %v2959_v49 = vld [vmem:[%s3857_s4 + $0x40] sm:$0xff] }
 0x181   : > { %3062 = vmatprep.subr.bf16.mxu1 %v3499_v50  ;;  %2946 = vmatmul.mubr.msk.f32.vlgmr.msra.gmra.mrb[6].mxu0 %vm387_vm3, %v2943_v46 }
 0x182   : > { %v963_v57 = vsel %vm959_vm8, %v3291_v54, %v3211_v51  ;;  %v962_v58 = vsel %vm959_vm8, %v3290_v55, %v3210_v52  ;;  %3064 = vmatpush1.bf16.msra.mxu1 %v3496_v47  ;;  %v960_v59 = vsel %vm959_vm8, %v3210_v52, %v3290_v55  ;;  %v961_v60 = vsel %vm959_vm8, %v3211_v51, %v3291_v54 }
 0x183   : > { %v3508_v62 = vpack.c.bf16 %v963_v57, %v962_v58  ;;  %v3224_v63 = vpop.permute.xlu0 %3223  ;;  %v3294_v1 = vpop.permute.xlu1 %3293  ;;  %v3511_v2 = vpack.c.bf16 %v961_v60, %v960_v59  ;;  %1031 = vmatprep.mubr.f32.mxu0 %v3355_v0 }
 0x184   : > { %v3296_v7 = vunpack.i.h.bf16 %v3294_v1  ;;  %v3295_v8 = vunpack.i.l.bf16 %v3294_v1  ;;  %v3226_v38 = vunpack.i.h.bf16 %v3224_v63  ;;  %v3225_v39 = vunpack.i.l.bf16 %v3224_v63 }
 0x185   : > { %3066 = vmatprep.subr.bf16.mxu0 %v3511_v2  ;;  %2950 = vmatmul.mubr.msk.f32.vlgmr.msra.gmra.mrb[6].mxu1 %vm387_vm3, %v2947_v61 }
 0x186   : > { %v1059_v9 = vsel %vm1055_vm9, %v3296_v7, %v3216_v4  ;;  %v1058_v10 = vsel %vm1055_vm9, %v3295_v8, %v3215_v5  ;;  %3068 = vmatpush1.bf16.msra.mxu0 %v3508_v62  ;;  %v1056_v11 = vsel %vm1055_vm9, %v3215_v5, %v3295_v8  ;;  %v1057_v12 = vsel %vm1055_vm9, %v3216_v4, %v3296_v7  ;;  %v2963_v5 = vld [vmem:[%s3857_s4 + $0x48] sm:$0xff] }
 0x187   : > { %v3520_v14 = vpack.c.bf16 %v1059_v9, %v1058_v10  ;;  %v3229_v15 = vpop.permute.xlu0 %3228  ;;  %v3299_v17 = vpop.permute.xlu1 %3298  ;;  %v3523_v18 = vpack.c.bf16 %v1057_v12, %v1056_v11  ;;  %1127 = vmatprep.mubr.f32.mxu1 %v3355_v0 }
 0x188   : > { %v3301_v22 = vunpack.i.h.bf16 %v3299_v17  ;;  %v3300_v23 = vunpack.i.l.bf16 %v3299_v17  ;;  %v3231_v57 = vunpack.i.h.bf16 %v3229_v15  ;;  %v3230_v58 = vunpack.i.l.bf16 %v3229_v15 }
 0x189   : > { %3070 = vmatprep.subr.bf16.mxu1 %v3523_v18  ;;  %2954 = vmatmul.mubr.msk.f32.vlgmr.msra.gmra.mrb[8].mxu0 %vm387_vm3, %v2951_v13 }
 0x18a   : > { %v1155_v26 = vsel %vm1151_vm10, %v3301_v22, %v3221_v20  ;;  %v1154_v27 = vsel %vm1151_vm10, %v3300_v23, %v3220_v21  ;;  %3072 = vmatpush1.bf16.msra.mxu1 %v3520_v14  ;;  %v1152_v28 = vsel %vm1151_vm10, %v3220_v21, %v3300_v23  ;;  %v1153_v30 = vsel %vm1151_vm10, %v3221_v20, %v3301_v22  ;;  %v2967_v23 = vld [vmem:[%s3857_s4 + $0x50] sm:$0xff] }
 0x18b   : > { %v3532_v33 = vpack.c.bf16 %v1155_v26, %v1154_v27  ;;  %v3234_v34 = vpop.permute.xlu0 %3233  ;;  %v3304_v36 = vpop.permute.xlu1 %3303  ;;  %v3535_v37 = vpack.c.bf16 %v1153_v30, %v1152_v28  ;;  %1223 = vmatprep.mubr.f32.mxu0 %v3355_v0 }
 0x18c   : > { %v3306_v40 = vunpack.i.h.bf16 %v3304_v36  ;;  %v3305_v41 = vunpack.i.l.bf16 %v3304_v36  ;;  %v3236_v11 = vunpack.i.h.bf16 %v3234_v34  ;;  %v3235_v12 = vunpack.i.l.bf16 %v3234_v34 }
 0x18d   : > { %3074 = vmatprep.subr.bf16.mxu0 %v3535_v37  ;;  %2958 = vmatmul.mubr.msk.f32.vlgmr.msra.gmra.mrb[8].mxu1 %vm387_vm3, %v2955_v31 }
 0x18e   : > { %v1251_v44 = vsel %vm1247_vm11, %v3306_v40, %v3226_v38  ;;  %v1250_v45 = vsel %vm1247_vm11, %v3305_v41, %v3225_v39  ;;  %3076 = vmatpush1.bf16.msra.mxu0 %v3532_v33  ;;  %v1248_v46 = vsel %vm1247_vm11, %v3225_v39, %v3305_v41  ;;  %v1249_v48 = vsel %vm1247_vm11, %v3226_v38, %v3306_v40 }
 0x18f   : > { %v3079_v51 = vpack.c.bf16 %v1251_v44, %v1250_v45  ;;  %v3239_v52 = vpop.permute.xlu0 %3238  ;;  %v3309_v54 = vpop.permute.xlu1 %3308  ;;  %v3077_v55 = vpack.c.bf16 %v1249_v48, %v1248_v46  ;;  %1319 = vmatprep.mubr.f32.mxu1 %v3355_v0  ;;  %v2971_v45 = vld [vmem:[%s3857_s4 + $0x58] sm:$0xff] }
 0x190   : > { %v3311_v59 = vunpack.i.h.bf16 %v3309_v54  ;;  %v3310_v60 = vunpack.i.l.bf16 %v3309_v54  ;;  %v3241_v30 = vunpack.i.h.bf16 %v3239_v52  ;;  %v3240_v31 = vunpack.i.l.bf16 %v3239_v52 }
 0x191   : > { %3078 = vmatprep.subr.bf16.mxu1 %v3077_v55  ;;  %2962 = vmatmul.mubr.msk.f32.vlgmr.msra.gmra.mrb[10].mxu0 %vm387_vm3, %v2959_v49 }
 0x192   : > { %v1347_v61 = vsel %vm1343_vm12, %v3311_v59, %v3231_v57  ;;  %v1346_v63 = vsel %vm1343_vm12, %v3310_v60, %v3230_v58  ;;  %3080 = vmatpush1.bf16.msra.mxu1 %v3079_v51  ;;  %v1344_v1 = vsel %vm1343_vm12, %v3230_v58, %v3310_v60  ;;  %v1345_v4 = vsel %vm1343_vm12, %v3231_v57, %v3311_v59  ;;  %v2975_v59 = vld [vmem:[%s3857_s4 + $0x60] sm:$0xff]  ;;  %v2979_v60 = vld [vmem:[%s3857_s4 + $0x68] sm:$0xff] }
 0x193   : > { %v3083_v7 = vpack.c.bf16 %v1347_v61, %v1346_v63  ;;  %v3244_v8 = vpop.permute.xlu0 %3243  ;;  %v3314_v9 = vpop.permute.xlu1 %3313  ;;  %v3081_v10 = vpack.c.bf16 %v1345_v4, %v1344_v1  ;;  %1415 = vmatprep.mubr.f32.mxu0 %v3355_v0 }
 0x194   : > { %v3316_v13 = vunpack.i.h.bf16 %v3314_v9  ;;  %v3315_v15 = vunpack.i.l.bf16 %v3314_v9  ;;  %v3246_v51 = vunpack.i.h.bf16 %v3244_v8  ;;  %v3245_v52 = vunpack.i.l.bf16 %v3244_v8 }
 0x195   : > { %3082 = vmatprep.subr.bf16.mxu0 %v3081_v10  ;;  %2966 = vmatmul.mubr.msk.f32.vlgmr.msra.gmra.mrb[10].mxu1 %vm387_vm3, %v2963_v5 }
 0x196   : > { %v1443_v17 = vsel %vm1439_vm13, %v3316_v13, %v3236_v11  ;;  %v1442_v20 = vsel %vm1439_vm13, %v3315_v15, %v3235_v12  ;;  %3084 = vmatpush1.bf16.msra.mxu0 %v3083_v7  ;;  %v1440_v21 = vsel %vm1439_vm13, %v3235_v12, %v3315_v15  ;;  %v1441_v22 = vsel %vm1439_vm13, %v3236_v11, %v3316_v13 }
 0x197   : > { %v3087_v26 = vpack.c.bf16 %v1443_v17, %v1442_v20  ;;  %v3319_v27 = vpop.permute.xlu1 %3318  ;;  %v3085_v28 = vpack.c.bf16 %v1441_v22, %v1440_v21  ;;  %1511 = vmatprep.mubr.f32.mxu1 %v3355_v0  ;;  %v3249_v38 = vpop.permute.xlu0 %3248 }
 0x198   : > { %v3321_v34 = vunpack.i.h.bf16 %v3319_v27  ;;  %v3320_v36 = vunpack.i.l.bf16 %v3319_v27  ;;  %v3251_v61 = vunpack.i.h.bf16 %v3249_v38  ;;  %v2983_v27 = vld [vmem:[%s3857_s4 + $0x70] sm:$0xff] }
 0x199   : > { %3086 = vmatprep.subr.bf16.mxu1 %v3085_v28  ;;  %2970 = vmatmul.mubr.msk.f32.vlgmr.msra.gmra.mrb[12].mxu0 %vm387_vm3, %v2967_v23 }
 0x19a   : > { %v1539_v39 = vsel %vm1535_vm14, %v3321_v34, %v3241_v30  ;;  %v1538_v40 = vsel %vm1535_vm14, %v3320_v36, %v3240_v31  ;;  %3088 = vmatpush1.bf16.msra.mxu1 %v3087_v26  ;;  %v1536_v41 = vsel %vm1535_vm14, %v3240_v31, %v3320_v36  ;;  %v1537_v44 = vsel %vm1535_vm14, %v3241_v30, %v3321_v34  ;;  %v2987_v34 = vld [vmem:[%s3857_s4 + $0x78] sm:$0xff] }
 0x19b   : > { %v3091_v46 = vpack.c.bf16 %v1539_v39, %v1538_v40  ;;  %v3324_v48 = vpop.permute.xlu1 %3323  ;;  %3094 = vmatprep.subr.bf16.mxu1 %v3432_v24  ;;  %v3089_v49 = vpack.c.bf16 %v1537_v44, %v1536_v41  ;;  %1607 = vmatprep.mubr.f32.mxu0 %v3355_v0  ;;  %v3254_v63 = vpop.permute.xlu0 %3253 }
 0x19c   : > { %v3326_v54 = vunpack.i.h.bf16 %v3324_v48  ;;  %v3325_v55 = vunpack.i.l.bf16 %v3324_v48  ;;  %v3256_v21 = vunpack.i.h.bf16 %v3254_v63  ;;  %v3255_v22 = vunpack.i.l.bf16 %v3254_v63  ;;  %v2937_v63 = vld [vmem:[%s3856_s3 + $0x28] sm:$0xff] }
 0x19d   : > { %3090 = vmatprep.subr.bf16.mxu0 %v3089_v49  ;;  %2974 = vmatmul.mubr.msk.f32.vlgmr.msra.gmra.mrb[12].mxu1 %vm387_vm3, %v2971_v45 }
 0x19e   : > { %v1716_v57 = vsel %vm1714_vm15, %v3246_v51, %v3326_v54  ;;  %v1715_v58 = vsel %vm1714_vm15, %v3245_v52, %v3325_v55  ;;  %3092 = vmatpush1.bf16.msra.mxu0 %v3091_v46  ;;  %3096 = vmatpush1.bf16.msra.mxu1 %v3434_v25  ;;  %v1717_v24 = vsel %vm1714_vm15, %v3325_v55, %v3245_v52  ;;  %v3250_v25 = vunpack.i.l.bf16 %v3249_v38  ;;  %v2991_v52 = vld [vmem:[%s3857_s4 + $0x80] sm:$0xff] }
 0x19f   : > { %v3329_v1 = vpop.permute.xlu1 %3328  ;;  %v1718_v4 = vsel %vm1714_vm15, %v3326_v54, %v3246_v51  ;;  %1690 = vmatprep.mubr.f32.mxu1 %v3355_v0  ;;  %v3099_v5 = vpack.c.bf16 %v1716_v57, %v1715_v58  ;;  %v3339_v28 = vpop.permute.xlu0 %3338 }
 0x1a0   : > { %v3331_v7 = vunpack.i.h.bf16 %v3329_v1  ;;  %v3330_v8 = vunpack.i.l.bf16 %v3329_v1  ;;  %v3097_v9 = vpack.c.bf16 %v1718_v4, %v1717_v24  ;;  %v3341_v44 = vunpack.i.h.bf16 %v3339_v28  ;;  %v2995_v24 = vld [vmem:[%s3857_s4 + $0x88] sm:$0xff] }
 0x1a1   : > { %2978 = vmatmul.mubr.msk.f32.vlgmr.msra.gmra.mrb[14].mxu0 %vm387_vm3, %v2975_v59  ;;  %2982 = vmatmul.mubr.msk.f32.vlgmr.msra.gmra.mrb[14].mxu1 %vm387_vm3, %v2979_v60  ;;  %v3340_v45 = vunpack.i.l.bf16 %v3339_v28  ;;  %v2936_v60 = vld [vmem:[%s3856_s3 + $0x20] sm:$0xff] }
 0x1a2   : > { %v1812_v10 = vsel %vm1810_vm0, %v3251_v61, %v3331_v7  ;;  %v1811_v11 = vsel %vm1810_vm0, %v3250_v25, %v3330_v8  ;;  %v1813_v12 = vsel %vm1810_vm0, %v3330_v8, %v3250_v25  ;;  %v1814_v13 = vsel %vm1810_vm0, %v3331_v7, %v3251_v61  ;;  %1786 = vmatprep.mubr.f32.mxu0 %v3355_v0  ;;  %v2940_v8 = vld [vmem:[%s3856_s3 + $0x30] sm:$0xff] }
 0x1a3   : > { %v3103_v15 = vpack.c.bf16 %v1812_v10, %v1811_v11  ;;  %3098 = vmatprep.subr.bf16.mxu0 %v3097_v9  ;;  %v3334_v17 = vpop.permute.xlu1 %3333  ;;  %v3101_v20 = vpack.c.bf16 %v1814_v13, %v1813_v12  ;;  %1882 = vmatprep.mubr.f32.mxu1 %v3355_v0  ;;  %v2941_v10 = vld [vmem:[%s3856_s3 + $0x38] sm:$0xff] }
 0x1a4   : > { %3100 = vmatpush1.bf16.msra.mxu0 %v3099_v5  ;;  %v3336_v23 = vunpack.i.h.bf16 %v3334_v17  ;;  %v3335_v26 = vunpack.i.l.bf16 %v3334_v17 }
 0x1a5   : > { %3102 = vmatprep.subr.bf16.mxu1 %v3101_v20  ;;  %v2944_v20 = vld [vmem:[%s3856_s3 + $0x40] sm:$0xff] }
 0x1a6   : > { %v1908_v30 = vsel %vm1906_vm1, %v3256_v21, %v3336_v23  ;;  %v1907_v31 = vsel %vm1906_vm1, %v3255_v22, %v3335_v26  ;;  %3104 = vmatpush1.bf16.msra.mxu1 %v3103_v15  ;;  %v1909_v36 = vsel %vm1906_vm1, %v3335_v26, %v3255_v22  ;;  %v1910_v38 = vsel %vm1906_vm1, %v3336_v23, %v3256_v21  ;;  %v2945_v22 = vld [vmem:[%s3856_s3 + $0x48] sm:$0xff] }
 0x1a7   : > { %v3107_v39 = vpack.c.bf16 %v1908_v30, %v1907_v31  ;;  %v3344_v40 = vpop.permute.xlu1 %3343  ;;  %2986 = vmatmul.mubr.msk.f32.vlgmr.msra.gmra.mrb[16].mxu0 %vm387_vm3, %v2983_v27  ;;  %v3105_v41 = vpack.c.bf16 %v1910_v38, %v1909_v36  ;;  %v2948_v31 = vld [vmem:[%s3856_s3 + $0x50] sm:$0xff]  ;;  %v2949_v36 = vld [vmem:[%s3856_s3 + $0x58] sm:$0xff] }
 0x1a8   : > { %v3346_v46 = vunpack.i.h.bf16 %v3344_v40  ;;  %v3345_v48 = vunpack.i.l.bf16 %v3344_v40  ;;  %1978 = vmatprep.mubr.f32.mxu0 %v3355_v0 }
 0x1a9   : > { %2990 = vmatmul.mubr.msk.f32.vlgmr.msra.gmra.mrb[16].mxu1 %vm387_vm3, %v2987_v34  ;;  %3106 = vmatprep.subr.bf16.mxu0 %v3105_v41 }
 0x1aa   : > { %v2004_v49 = vsel %vm2002_vm2, %v3341_v44, %v3346_v46  ;;  %v2003_v51 = vsel %vm2002_vm2, %v3340_v45, %v3345_v48  ;;  %3108 = vmatpush1.bf16.msra.mxu0 %v3107_v39  ;;  %v2005_v54 = vsel %vm2002_vm2, %v3345_v48, %v3340_v45  ;;  %v2006_v55 = vsel %vm2002_vm2, %v3346_v46, %v3341_v44  ;;  %v2952_v45 = vld [vmem:[%s3856_s3 + $0x60] sm:$0xff]  ;;  %v2953_v48 = vld [vmem:[%s3856_s3 + $0x68] sm:$0xff] }
 0x1ab   : > { %v3111_v57 = vpack.c.bf16 %v2004_v49, %v2003_v51  ;;  %3114 = vmatprep.subr.bf16.mxu0 %v3442_v43  ;;  %v3109_v58 = vpack.c.bf16 %v2006_v55, %v2005_v54  ;;  %2074 = vmatprep.mubr.f32.mxu1 %v3355_v0  ;;  %v3007_v43 = vld [vmem:[%s3857_s4 + $0xa0] sm:$0xff] }
 0x1ad   : > { %2994 = vmatmul.mubr.msk.f32.vlgmr.msra.gmra.mrb[18].mxu0 %vm387_vm3, %v2991_v52  ;;  %3110 = vmatprep.subr.bf16.mxu1 %v3109_v58 }
 0x1ae   : > { %3112 = vmatpush1.bf16.msra.mxu1 %v3111_v57  ;;  %3116 = vmatpush1.bf16.msra.mxu0 %v3440_v42  ;;  %v3003_v42 = vld [vmem:[%s3857_s4 + $0x98] sm:$0xff]  ;;  %v2956_v57 = vld [vmem:[%s3856_s3 + $0x70] sm:$0xff] }
 0x1af   : > { %3118 = vmatprep.subr.bf16.mxu1 %v3449_v53  ;;  %3122 = vmatprep.subr.bf16.mxu0 %v3460_v3  ;;  %v3011_v53 = vld [vmem:[%s3857_s4 + $0xa8] sm:$0xff]  ;;  %v3019_v3 = vld [vmem:[%s3857_s4 + $0xb8] sm:$0xff] }
 0x1b0   : > { %2157 = vmatprep.mubr.f32.mxu0 %v3355_v0 }
 0x1b1   : > { %2998 = vmatmul.mubr.msk.f32.vlgmr.msra.gmra.mrb[18].mxu1 %vm387_vm3, %v2995_v24  ;;  %3002 = vmatmul.mubr.msk.f32.vlgmr.msra.gmra.mrb[20].mxu0 %vm387_vm3, %v2999_v29  ;;  %v2957_v24 = vld [vmem:[%s3856_s3 + $0x78] sm:$0xff] }
 0x1b2   : > { %3120 = vmatpush1.bf16.msra.mxu1 %v3452_v56  ;;  %3124 = vmatpush1.bf16.msra.mxu0 %v3463_v6  ;;  %v3015_v56 = vld [vmem:[%s3857_s4 + $0xb0] sm:$0xff]  ;;  %v3023_v6 = vld [vmem:[%s3857_s4 + $0xc0] sm:$0xff] }
 0x1b3   : > { %3126 = vmatprep.subr.bf16.mxu1 %v3472_v16  ;;  %3130 = vmatprep.subr.bf16.mxu0 %v3484_v32  ;;  %v3027_v16 = vld [vmem:[%s3857_s4 + $0xc8] sm:$0xff]  ;;  %v370_v32 = vld [vmem:[%s3856_s3] sm:$0xff] }
 0x1b4   : > { %2240 = vmatprep.mubr.f32.mxu1 %v3355_v0  ;;  %2323 = vmatprep.mubr.f32.mxu0 %v3355_v0 }
 0x1b5   : > { %3006 = vmatmul.mubr.msk.f32.vlgmr.msra.gmra.mrb[20].mxu1 %vm387_vm3, %v3003_v42  ;;  %3010 = vmatmul.mubr.msk.f32.vlgmr.msra.gmra.mrb[22].mxu0 %vm387_vm3, %v3007_v43 }
 0x1b6   : > { %3128 = vmatpush1.bf16.msra.mxu1 %v3475_v19  ;;  %3132 = vmatpush1.bf16.msra.mxu0 %v3487_v35  ;;  %v3031_v19 = vld [vmem:[%s3857_s4 + $0xd0] sm:$0xff] }
 0x1b7   : > { %3134 = vmatprep.subr.bf16.mxu1 %v3496_v47  ;;  %3138 = vmatprep.subr.bf16.mxu0 %v3508_v62  ;;  %v371_v47 = vld [vmem:[%s3856_s3 + $0x8] sm:$0xff]  ;;  %v2932_v62 = vld [vmem:[%s3856_s3 + $0x10] sm:$0xff] }
 0x1b8   : > { %2406 = vmatprep.mubr.f32.mxu1 %v3355_v0  ;;  %2489 = vmatprep.mubr.f32.mxu0 %v3355_v0 }
 0x1b9   : > { %3014 = vmatmul.mubr.msk.f32.vlgmr.msra.gmra.mrb[22].mxu1 %vm387_vm3, %v3011_v53  ;;  %3018 = vmatmul.mubr.msk.f32.vlgmr.msra.gmra.mrb[24].mxu0 %vm387_vm3, %v3015_v56 }
 0x1ba   : > { %3136 = vmatpush1.bf16.msra.mxu1 %v3499_v50  ;;  %3140 = vmatpush1.bf16.msra.mxu0 %v3511_v2 }
 0x1bb   : > { %3142 = vmatprep.subr.bf16.mxu1 %v3520_v14  ;;  %3146 = vmatprep.subr.bf16.mxu0 %v3532_v33 }
 0x1bc   : > { %2572 = vmatprep.mubr.f32.mxu1 %v3355_v0  ;;  %2655 = vmatprep.mubr.f32.mxu0 %v3355_v0 }
 0x1bd   : > { %3022 = vmatmul.mubr.msk.f32.vlgmr.msra.gmra.mrb[24].mxu1 %vm387_vm3, %v3019_v3  ;;  %3026 = vmatmul.mubr.msk.f32.vlgmr.msra.gmra.mrb[26].mxu0 %vm387_vm3, %v3023_v6  ;;  %v2960_v3 = vld [vmem:[%s3856_s3 + $0x80] sm:$0xff] }
 0x1be   : > { %3144 = vmatpush1.bf16.msra.mxu1 %v3523_v18  ;;  %3148 = vmatpush1.bf16.msra.mxu0 %v3535_v37 }
 0x1bf   : > { %2738 = vmatprep.mubr.f32.mxu1 %v3355_v0  ;;  %2821 = vmatprep.mubr.f32.mxu0 %v3355_v0  ;;  %v2933_v0 = vld [vmem:[%s3856_s3 + $0x18] sm:$0xff] }
 0x1c1   : > { %3030 = vmatmul.mubr.msk.f32.vlgmr.msra.gmra.mrb[26].mxu1 %vm387_vm3, %v3027_v16  ;;  %3034 = vmatmul.mubr.msk.f32.vlgmr.msra.gmra.mrb[28].mxu0 %vm387_vm3, %v3031_v19  ;;  %v2961_v16 = vld [vmem:[%s3856_s3 + $0x88] sm:$0xff] }
 0x244   : > { %v457_v35 = vpop.f32.mrb[0].mxu1 }
 0x245   : > { %v459_v50 = vpop.f32.mrb[1].mxu1  ;;  %v462_v2 = vmul.f32 %v457_v35, %v370_v32 }
 0x246   : > { %v463_v14 = vmul.f32 %v459_v50, %v371_v47 }
 0x248   : > { %v553_v18 = vpop.f32.mrb[2].mxu1 }
 0x249   : > { %v558_v33 = vmul.f32 %v2932_v62, %v553_v18  ;;  %v555_v37 = vpop.f32.mrb[3].mxu1  ;;  %v2964_v62 = vld [vmem:[%s3856_s3 + $0x90] sm:$0xff] }
 0x24a   : > { %v559_v59 = vmul.f32 %v2933_v0, %v555_v37  ;;  %v2965_v0 = vld [vmem:[%s3856_s3 + $0x98] sm:$0xff] }
 0x24b   : > { %v560_v61 = vadd.f32 %v558_v33, %v462_v2 }
 0x24c   : > { %v561_v1 = vadd.f32 %v559_v59, %v463_v14  ;;  %v649_v4 = vpop.f32.mrb[4].mxu0 }
 0x24d   : > { %v654_v25 = vmul.f32 %v2936_v60, %v649_v4  ;;  %v651_v5 = vpop.f32.mrb[5].mxu0  ;;  %v2968_v60 = vld [vmem:[%s3856_s3 + $0xa0] sm:$0xff] }
 0x24e   : > { %v655_v7 = vmul.f32 %v2937_v63, %v651_v5  ;;  %v2969_v63 = vld [vmem:[%s3856_s3 + $0xa8] sm:$0xff] }
 0x24f   : > { %v656_v9 = vadd.f32 %v654_v25, %v560_v61 }
 0x250   : > { %v657_v11 = vadd.f32 %v655_v7, %v561_v1  ;;  %v745_v12 = vpop.f32.mrb[4].mxu1 }
 0x251   : > { %v750_v13 = vmul.f32 %v2940_v8, %v745_v12  ;;  %v747_v15 = vpop.f32.mrb[5].mxu1  ;;  %v2972_v8 = vld [vmem:[%s3856_s3 + $0xb0] sm:$0xff] }
 0x252   : > { %v751_v17 = vmul.f32 %v2941_v10, %v747_v15  ;;  %v2973_v10 = vld [vmem:[%s3856_s3 + $0xb8] sm:$0xff] }
 0x253   : > { %v752_v21 = vadd.f32 %v750_v13, %v656_v9 }
 0x254   : > { %v753_v23 = vadd.f32 %v751_v17, %v657_v11  ;;  %v841_v26 = vpop.f32.mrb[6].mxu0 }
 0x255   : > { %v846_v27 = vmul.f32 %v2944_v20, %v841_v26  ;;  %v843_v28 = vpop.f32.mrb[7].mxu0  ;;  %v2976_v20 = vld [vmem:[%s3856_s3 + $0xc0] sm:$0xff]  ;;  %v2981_v26 = vld [vmem:[%s3856_s3 + $0xd8] sm:$0xff] }
 0x256   : > { %v847_v30 = vmul.f32 %v2945_v22, %v843_v28 }
 0x257   : > { %v848_v34 = vadd.f32 %v846_v27, %v752_v21  ;;  %v2980_v21 = vld [vmem:[%s3856_s3 + $0xd0] sm:$0xff] }
 0x258   : > { %v849_v38 = vadd.f32 %v847_v30, %v753_v23  ;;  %v937_v39 = vpop.f32.mrb[6].mxu1  ;;  %v2977_v23 = vld [vmem:[%s3856_s3 + $0xc8] sm:$0xff] }
 0x259   : > { %v942_v40 = vmul.f32 %v2948_v31, %v937_v39  ;;  %v939_v41 = vpop.f32.mrb[7].mxu1 }
 0x25a   : > { %v943_v44 = vmul.f32 %v2949_v36, %v939_v41 }
 0x25b   : > { %v944_v46 = vadd.f32 %v942_v40, %v848_v34 }
 0x25c   : > { %v945_v49 = vadd.f32 %v943_v44, %v849_v38  ;;  %v1033_v51 = vpop.f32.mrb[8].mxu0 }
 0x25d   : > { %v1038_v52 = vmul.f32 %v2952_v45, %v1033_v51  ;;  %v1035_v54 = vpop.f32.mrb[9].mxu0  ;;  %v2984_v45 = vld [vmem:[%s3856_s3 + $0xe0] sm:$0xff] }
 0x25e   : > { %v1039_v55 = vmul.f32 %v2953_v48, %v1035_v54  ;;  %v2985_v48 = vld [vmem:[%s3856_s3 + $0xe8] sm:$0xff] }
 0x25f   : > { %v1040_v58 = vadd.f32 %v1038_v52, %v944_v46  ;;  %v2988_v52 = vld [vmem:[%s3856_s3 + $0xf0] sm:$0xff] }
 0x260   : > { %v1041_v29 = vadd.f32 %v1039_v55, %v945_v49  ;;  %v1129_v42 = vpop.f32.mrb[8].mxu1 }
 0x261   : > { %v1134_v43 = vmul.f32 %v2956_v57, %v1129_v42  ;;  %v1131_v53 = vpop.f32.mrb[9].mxu1  ;;  %v2989_v57 = vld [vmem:[%s3856_s3 + $0xf8] sm:$0xff] }
 0x262   : > { %v1135_v56 = vmul.f32 %v2957_v24, %v1131_v53 }
 0x263   : > { %v1136_v6 = vadd.f32 %v1134_v43, %v1040_v58 }
 0x264   : > { %v1137_v19 = vadd.f32 %v1135_v56, %v1041_v29  ;;  %v1225_v32 = vpop.f32.mrb[10].mxu0 }
 0x265   : > { %v1230_v35 = vmul.f32 %v2960_v3, %v1225_v32  ;;  %v1227_v47 = vpop.f32.mrb[11].mxu0  ;;  %v2992_v3 = vld [vmem:[%s3856_s3 + $0x100] sm:$0xff] }
 0x266   : > { %v1231_v50 = vmul.f32 %v2961_v16, %v1227_v47  ;;  %v2993_v16 = vld [vmem:[%s3856_s3 + $0x108] sm:$0xff] }
 0x267   : > { %v1232_v2 = vadd.f32 %v1230_v35, %v1136_v6 }
 0x268   : > { %v1233_v14 = vadd.f32 %v1231_v50, %v1137_v19  ;;  %v1321_v18 = vpop.f32.mrb[10].mxu1 }
 0x269   : > { %v1326_v33 = vmul.f32 %v2964_v62, %v1321_v18  ;;  %v1323_v37 = vpop.f32.mrb[11].mxu1  ;;  %v2996_v62 = vld [vmem:[%s3856_s3 + $0x110] sm:$0xff]  ;;  %v3001_v18 = vld [vmem:[%s3856_s3 + $0x128] sm:$0xff] }
 0x26a   : > { %v1327_v59 = vmul.f32 %v2965_v0, %v1323_v37 }
 0x26b   : > { %v1328_v61 = vadd.f32 %v1326_v33, %v1232_v2  ;;  %v3000_v2 = vld [vmem:[%s3856_s3 + $0x120] sm:$0xff] }
 0x26c   : > { %v1329_v1 = vadd.f32 %v1327_v59, %v1233_v14  ;;  %v1417_v4 = vpop.f32.mrb[12].mxu0  ;;  %v2997_v14 = vld [vmem:[%s3856_s3 + $0x118] sm:$0xff] }
 0x26d   : > { %v1422_v25 = vmul.f32 %v2968_v60, %v1417_v4  ;;  %v1419_v5 = vpop.f32.mrb[13].mxu0 }
 0x26e   : > { %v1423_v7 = vmul.f32 %v2969_v63, %v1419_v5  ;;  %v3004_v5 = vld [vmem:[%s3856_s3 + $0x130] sm:$0xff] }
 0x26f   : > { %v1424_v9 = vadd.f32 %v1422_v25, %v1328_v61 }
 0x270   : > { %v1425_v11 = vadd.f32 %v1423_v7, %v1329_v1  ;;  %v1513_v12 = vpop.f32.mrb[12].mxu1  ;;  %v3008_v7 = vld [vmem:[%s3856_s3 + $0x140] sm:$0xff] }
 0x271   : > { %v1518_v13 = vmul.f32 %v2972_v8, %v1513_v12  ;;  %v1515_v15 = vpop.f32.mrb[13].mxu1 }
 0x272   : > { %v1519_v17 = vmul.f32 %v2973_v10, %v1515_v15  ;;  %v3009_v10 = vld [vmem:[%s3856_s3 + $0x148] sm:$0xff] }
 0x273   : > { %v1520_v22 = vadd.f32 %v1518_v13, %v1424_v9  ;;  %v3005_v9 = vld [vmem:[%s3856_s3 + $0x138] sm:$0xff] }
 0x274   : > { %v1521_v27 = vadd.f32 %v1519_v17, %v1425_v11  ;;  %v1609_v28 = vpop.f32.mrb[14].mxu0  ;;  %v1692_v30 = vpop.f32.mrb[14].mxu1 }
 0x275   : > { %v1614_v31 = vmul.f32 %v2976_v20, %v1609_v28  ;;  %v1611_v34 = vpop.f32.mrb[15].mxu0  ;;  %v1697_v36 = vmul.f32 %v2980_v21, %v1692_v30  ;;  %v1694_v38 = vpop.f32.mrb[15].mxu1  ;;  %v3012_v28 = vld [vmem:[%s3856_s3 + $0x150] sm:$0xff]  ;;  %v3016_v30 = vld [vmem:[%s3856_s3 + $0x160] sm:$0xff] }
 0x276   : > { %v1615_v39 = vmul.f32 %v2977_v23, %v1611_v34  ;;  %v1698_v40 = vmul.f32 %v2981_v26, %v1694_v38  ;;  %v3013_v34 = vld [vmem:[%s3856_s3 + $0x158] sm:$0xff] }
 0x277   : > { %v1616_v41 = vadd.f32 %v1614_v31, %v1520_v22 }
 0x278   : > { %v1617_v44 = vadd.f32 %v1615_v39, %v1521_v27 }
 0x279   : > { %v1699_v46 = vadd.f32 %v1697_v36, %v1616_v41  ;;  %v3017_v36 = vld [vmem:[%s3856_s3 + $0x168] sm:$0xff] }
 0x27a   : > { %v1700_v49 = vadd.f32 %v1698_v40, %v1617_v44  ;;  %v1788_v51 = vpop.f32.mrb[16].mxu0 }
 0x27b   : > { %v1793_v54 = vmul.f32 %v2984_v45, %v1788_v51  ;;  %v1790_v55 = vpop.f32.mrb[17].mxu0 }
 0x27c   : > { %v1794_v58 = vmul.f32 %v2985_v48, %v1790_v55  ;;  %v1884_v24 = vpop.f32.mrb[16].mxu1  ;;  %v3024_v55 = vld [vmem:[%s3856_s3 + $0x180] sm:$0xff] }
 0x27d   : > { %v1795_v29 = vadd.f32 %v1793_v54, %v1699_v46  ;;  %v1889_v42 = vmul.f32 %v2988_v52, %v1884_v24  ;;  %v1886_v43 = vpop.f32.mrb[17].mxu1  ;;  %v3020_v54 = vld [vmem:[%s3856_s3 + $0x170] sm:$0xff]  ;;  %v3025_v24 = vld [vmem:[%s3856_s3 + $0x188] sm:$0xff] }
 0x27e   : > { %v1796_v53 = vadd.f32 %v1794_v58, %v1700_v49  ;;  %v1890_v56 = vmul.f32 %v2989_v57, %v1886_v43  ;;  %v3021_v58 = vld [vmem:[%s3856_s3 + $0x178] sm:$0xff] }
 0x27f   : > { %v1891_v6 = vadd.f32 %v1889_v42, %v1795_v29 }
 0x280   : > { %v1892_v19 = vadd.f32 %v1890_v56, %v1796_v53  ;;  %v1980_v32 = vpop.f32.mrb[18].mxu0 }
 0x281   : > { %v1985_v35 = vmul.f32 %v2992_v3, %v1980_v32  ;;  %v1982_v47 = vpop.f32.mrb[19].mxu0 }
 0x282   : > { %v1986_v50 = vmul.f32 %v2993_v16, %v1982_v47  ;;  %v3028_v47 = vld [vmem:[%s3856_s3 + $0x190] sm:$0xff] }
 0x283   : > { %v1987_v0 = vadd.f32 %v1985_v35, %v1891_v6 }
 0x284   : > { %v1988_v33 = vadd.f32 %v1986_v50, %v1892_v19  ;;  %v2076_v37 = vpop.f32.mrb[18].mxu1  ;;  %v2159_v59 = vpop.f32.mrb[20].mxu0  ;;  %v3032_v50 = vld [vmem:[%s3856_s3 + $0x1a0] sm:$0xff] }
 0x285   : > { %v2081_v60 = vmul.f32 %v2996_v62, %v2076_v37  ;;  %v2078_v61 = vpop.f32.mrb[19].mxu1  ;;  %v2164_v63 = vmul.f32 %v3000_v2, %v2159_v59  ;;  %v2161_v1 = vpop.f32.mrb[21].mxu0  ;;  %v3029_v2 = vld [vmem:[%s3856_s3 + $0x198] sm:$0xff] }
 0x286   : > { %v2082_v4 = vmul.f32 %v2997_v14, %v2078_v61  ;;  %v2165_v25 = vmul.f32 %v3001_v18, %v2161_v1 }
 0x287   : > { %v2083_v8 = vadd.f32 %v2081_v60, %v1987_v0  ;;  %v3033_v0 = vld [vmem:[%s3856_s3 + $0x1a8] sm:$0xff] }
 0x288   : > { %v2084_v11 = vadd.f32 %v2082_v4, %v1988_v33  ;;  %v2242_v12 = vpop.f32.mrb[20].mxu1  ;;  %v2325_v13 = vpop.f32.mrb[22].mxu0 }
 0x289   : > { %v2166_v15 = vadd.f32 %v2164_v63, %v2083_v8  ;;  %v2247_v17 = vmul.f32 %v3004_v5, %v2242_v12  ;;  %v2244_v20 = vpop.f32.mrb[21].mxu1  ;;  %v2330_v21 = vmul.f32 %v3008_v7, %v2325_v13  ;;  %v2327_v22 = vpop.f32.mrb[23].mxu0 }
 0x28a   : > { %v2167_v23 = vadd.f32 %v2165_v25, %v2084_v11  ;;  %v2248_v26 = vmul.f32 %v3005_v9, %v2244_v20  ;;  %v2331_v27 = vmul.f32 %v3009_v10, %v2327_v22 }
 0x28b   : > { %v2249_v31 = vadd.f32 %v2247_v17, %v2166_v15 }
 0x28c   : > { %v2250_v38 = vadd.f32 %v2248_v26, %v2167_v23  ;;  %v2408_v39 = vpop.f32.mrb[22].mxu1  ;;  %v2491_v40 = vpop.f32.mrb[24].mxu0 }
 0x28d   : > { %v2332_v41 = vadd.f32 %v2330_v21, %v2249_v31  ;;  %v2413_v44 = vmul.f32 %v3012_v28, %v2408_v39  ;;  %v2410_v45 = vpop.f32.mrb[23].mxu1  ;;  %v2496_v46 = vmul.f32 %v3016_v30, %v2491_v40  ;;  %v2493_v48 = vpop.f32.mrb[25].mxu0 }
 0x28e   : > { %v2333_v49 = vadd.f32 %v2331_v27, %v2250_v38  ;;  %v2414_v51 = vmul.f32 %v3013_v34, %v2410_v45  ;;  %v2497_v52 = vmul.f32 %v3017_v36, %v2493_v48 }
 0x28f   : > { %v2415_v57 = vadd.f32 %v2413_v44, %v2332_v41 }
 0x290   : > { %v2416_v29 = vadd.f32 %v2414_v51, %v2333_v49  ;;  %v2574_v42 = vpop.f32.mrb[24].mxu1  ;;  %v2657_v43 = vpop.f32.mrb[26].mxu0 }
 0x291   : > { %v2498_v53 = vadd.f32 %v2496_v46, %v2415_v57  ;;  %v2579_v56 = vmul.f32 %v3020_v54, %v2574_v42  ;;  %v2576_v3 = vpop.f32.mrb[25].mxu1  ;;  %v2662_v6 = vmul.f32 %v3024_v55, %v2657_v43  ;;  %v2659_v16 = vpop.f32.mrb[27].mxu0 }
 0x292   : > { %v2499_v19 = vadd.f32 %v2497_v52, %v2416_v29  ;;  %v2580_v32 = vmul.f32 %v3021_v58, %v2576_v3  ;;  %v2663_v35 = vmul.f32 %v3025_v24, %v2659_v16 }
 0x293   : > { %v2581_v62 = vadd.f32 %v2579_v56, %v2498_v53 }
 0x294   : > { %v2582_v14 = vadd.f32 %v2580_v32, %v2499_v19  ;;  %v2740_v18 = vpop.f32.mrb[26].mxu1  ;;  %v2823_v33 = vpop.f32.mrb[28].mxu0 }
 0x295   : > { %v2664_v37 = vadd.f32 %v2662_v6, %v2581_v62  ;;  %v2745_v59 = vmul.f32 %v3028_v47, %v2740_v18  ;;  %v2742_v60 = vpop.f32.mrb[27].mxu1  ;;  %v2828_v61 = vmul.f32 %v3032_v50, %v2823_v33  ;;  %v2825_v63 = vpop.f32.mrb[29].mxu0 }
 0x296   : > { %v2665_v1 = vadd.f32 %v2663_v35, %v2582_v14  ;;  %v2746_v4 = vmul.f32 %v3029_v2, %v2742_v60  ;;  %v2829_v25 = vmul.f32 %v3033_v0, %v2825_v63 }
 0x297   : > { %v2747_v5 = vadd.f32 %v2745_v59, %v2664_v37 }
 0x298   : > { %v2748_v7 = vadd.f32 %v2746_v4, %v2665_v1 }
 0x299   : > { %v2830_v8 = vadd.f32 %v2828_v61, %v2747_v5 }
 0x29a   : > { %v2831_v9 = vadd.f32 %v2829_v25, %v2748_v7 }
 0x29b   : > { %2834 = vst [vmem:[%s3420_s27 + $0x10] sm:$0xff] %v2830_v8 }
 0x29c   : > { %2835 = vst [vmem:[%s3420_s27 + $0x18] sm:$0xff] %v2831_v9 }
 0x29d PF: > { %s15_s18 = sadd.s32 1, %s3353_s18  }
 0x29e   : > { %p12_p4 = scmp.ge.s32.totalorder %s15_s18, 4  }
 0x2a0   :  { %14 = sbr.rel (!%p12_p4) target bundleno = 1 (0x1), region = 128 }

</bundles_post_ra>
